<compile_context>
chip_gen: v7x
topology: tpu7x:2x2x1
jax: 0.10.0
libtpu: 0.0.40
codegen_flags: <defaults>
</compile_context>

<pallas_src>
import functools
import math

import jax
import jax.numpy as jnp
import numpy as np
from jax import lax
from jax.experimental import pallas as pl
from jax.experimental.pallas import tpu as pltpu


def _round8(n):
    return ((n + 7) // 8) * 8


# ---------------------------------------------------------------------------
# torch _auto_pad_1d semantics (used by the pure-JAX reference below)
# ---------------------------------------------------------------------------
def _auto_pad_1d(x, kernel_size, stride=1, padding_value=0.0):
    L = x.shape[-1]
    pds = (stride - L % stride) % stride + kernel_size - stride
    lo, hi = pds // 2, pds - pds // 2
    pad = [(0, 0)] * (x.ndim - 1) + [(lo, hi)]
    return jnp.pad(x, pad, constant_values=padding_value)


# ---------------------------------------------------------------------------
# Host-side packing: every conv weight + bias -> ONE VMEM-resident slab
# ---------------------------------------------------------------------------
def _pack_params(layer_params, in_c):
    """Pack all convs of the block into a single 2-D weight slab.

    Shared im2col column layout (mirrored by the kernel):
      col 0                      : ones row  (bias)     cols 1..7 : zero
      col 8 + t*TR + off_p + c   : tap t (offset d_list[t]), piece p, channel c
    with TR = sum(round8(c_piece)) and off_p stepping by round8(c_piece).
    All branch convs of one layer are stacked into one weight block so their
    outputs come out of a single MXU matmul.
    """
    plan = []
    blocks = []
    wrow = 0
    max_cols = 8
    max_tr = 8
    cur_c = in_c
    for lp in layer_params:
        out_c = int(np.asarray(lp['out_w']).shape[0])
        branch_ks = [int(k) for k in lp['kernel_sizes']]
        n_br = len(branch_ks)

        # ---- stacked branch convs (they all share the same input `cur`) ----
        min_d = min(-((k - 1) // 2) for k in branch_ks)
        max_d = max(k - 1 - (k - 1) // 2 for k in branch_ks)
        d_list_b = tuple(range(min_d, max_d + 1))
        tr_b = _round8(cur_c)
        cols_b = 8 + len(d_list_b) * tr_b
        wb = np.zeros((n_br * out_c, cols_b), np.float32)
        for bi, ((w, b), K) in enumerate(zip(lp['branches'], branch_ks)):
            w = np.asarray(w, np.float32)
            b = np.asarray(b, np.float32)
            pad_lo = (K - 1) // 2
            r0 = bi * out_c
            wb[r0:r0 + out_c, 0] = b
            for k in range(K):
                t = (k - pad_lo) - min_d
                c0 = 8 + t * tr_b
                wb[r0:r0 + out_c, c0:c0 + cur_c] = w[:, :, k]
        blocks.append(wb)
        b_stage = (wrow, cols_b, d_list_b, n_br, out_c)
        wrow += n_br * out_c
        max_cols = max(max_cols, cols_b)
        max_tr = max(max_tr, tr_b)

        # ---- out conv (input = channel-concat of [cur] + branch outputs) ----
        Ko = int(lp['out_kernel_size'])
        pad_lo_o = (Ko - 1) // 2
        d_list_o = tuple(range(-pad_lo_o, Ko - pad_lo_o))
        piece_cs = [cur_c] + [out_c] * n_br
        tr_o = sum(_round8(c) for c in piece_cs)
        cols_o = 8 + Ko * tr_o
        wo_blk = np.zeros((out_c, cols_o), np.float32)
        wo = np.asarray(lp['out_w'], np.float32)
        wo_blk[:, 0] = np.asarray(lp['out_b'], np.float32)
        for k in range(Ko):
            c0 = 8 + k * tr_o
            src_ch, off = 0, 0
            for c in piece_cs:
                wo_blk[:, c0 + off:c0 + off + c] = wo[:, src_ch:src_ch + c, k]
                src_ch += c
                off += _round8(c)
        blocks.append(wo_blk)
        o_stage = (wrow, cols_o, d_list_o, out_c)
        wrow += out_c
        max_cols = max(max_cols, cols_o)
        max_tr = max(max_tr, tr_o)

        plan.append((b_stage, o_stage))
        cur_c = out_c

    w_slab = np.zeros((wrow, max_cols), np.float32)
    r = 0
    for blk in blocks:
        w_slab[r:r + blk.shape[0], :blk.shape[1]] = blk
        r += blk.shape[0]
    return jnp.asarray(w_slab), tuple(plan), max_cols, max_tr, cur_c


# ---------------------------------------------------------------------------
# Fused kernel: whole BasicBlock forward for a tile of b_tile samples
# ---------------------------------------------------------------------------
def _basic_block_kernel(x_ref, w_ref, lane_ref, src_ref, o_ref, col_ref,
                        stage_ref, *, plan, in_c, seq_len, b_tile, pool_size,
                        l_out, margin):
    f32 = jnp.float32
    L = seq_len
    BL = b_tile * L
    out_lanes = b_tile * l_out
    M = margin

    # Once per grid step: zero both scratch slabs (never-written pad rows must
    # stay finite -- their weight columns are zero) and plant the bias ones-row.
    col_ref[...] = jnp.zeros(col_ref.shape, f32)
    stage_ref[...] = jnp.zeros(stage_ref.shape, f32)
    col_ref[0:1, :] = jnp.ones((1, BL), f32)

    lane_pos = lane_ref[...]                 # (1, BL): lane position within its sample
    src = src_ref[...]                       # (1, out_lanes): pooled window start lane

    def im2col(pieces, d_list):
        """pieces: [(value (c, BL), c)] -> fill col_ref rows 8 .. 8+len(d_list)*TR."""
        tap_rows = sum(_round8(c) for _, c in pieces)
        r = 0
        for v, c in pieces:                  # stage the row-padded channel concat once
            stage_ref[r:r + c, M:M + BL] = v
            r += _round8(c)
        sv = stage_ref[0:tap_rows, :]        # (TR, BL + 2M)
        for t, d in enumerate(d_list):
            win = sv[:, M + d:M + d + BL]    # win[:, j] = concat[:, j + d]
            if d != 0:                       # per-sample 'same' padding
                lo = -d if d < 0 else 0
                hi = L - d if d > 0 else L
                win = jnp.where((lane_pos >= lo) & (lane_pos < hi), win, 0.0)
            col_ref[8 + t * tap_rows:8 + (t + 1) * tap_rows, :] = win

    def conv_relu(wrow, n_out, rows):
        w = w_ref[wrow:wrow + n_out, 0:rows]
        y = jnp.dot(w, col_ref[0:rows, :], preferred_element_type=f32)
        return jnp.maximum(y, 0.0)           # bias already folded in via ones-row

    x = x_ref[...].astype(f32)               # (in_c, BL)
    cur, cur_c = x, in_c
    for b_stage, o_stage in plan:            # CombConvLayer stack
        wrow_b, rows_b, d_list_b, n_br, out_c = b_stage
        im2col([(cur, cur_c)], d_list_b)
        yb = conv_relu(wrow_b, n_br * out_c, rows_b)     # all branches, one matmul
        pieces = [(cur, cur_c)] + [
            (yb[i * out_c:(i + 1) * out_c, :], out_c) for i in range(n_br)]
        # TODO(synk): nn.Dropout between the concat and out_conv is identity at inference.
        wrow_o, rows_o, d_list_o, _ = o_stage
        im2col(pieces, d_list_o)
        cur = conv_relu(wrow_o, out_c, rows_o)
        cur_c = out_c

    # torch.cat([x, x1], dim=1) + MaxPool1d(pool_size): exact 0/1 selection
    # matmuls gather lane (src + p) for each pool offset p, a running max
    # combines them, and the store is a lane-dense (c, b_tile*l_out) block.
    j_idx = lax.broadcasted_iota(jnp.int32, (BL, out_lanes), 0)
    sels = [(j_idx == src + p).astype(f32) for p in range(pool_size)]

    def pool_into(row0, v, c):
        acc = None
        for sel in sels:
            y = jnp.dot(v, sel, preferred_element_type=f32)
            acc = y if acc is None else jnp.maximum(acc, y)
        o_ref[row0:row0 + c, :] = acc.astype(o_ref.dtype)

    pool_into(0, x, in_c)
    pool_into(in_c, cur, cur_c)


# ---------------------------------------------------------------------------
# Wrapper
# ---------------------------------------------------------------------------
def _choose_b_tile(n, L, l_out, target_lanes=256):
    # If the batch splits into >1 tile, both b*L and b*l_out must be multiples
    # of 128 (BlockSpec lane rule); a single full-array tile is exempt.
    m = 1
    for d in (L, max(l_out, 1)):
        need = 128 // math.gcd(d, 128)
        m = m * need // math.gcd(m, need)
    b = m
    while b * L < target_lanes:
        b += m
    return n if n <= b else b


def basic_block_forward(x, layer_params, pool_size, *, target_lanes=256):
    N, in_c, L = x.shape
    pool_size = int(pool_size)
    l_out = L // pool_size
    assert l_out >= 1 and len(layer_params) >= 1

    w_slab, plan, slab_rows, max_tr, last_c = _pack_params(layer_params, in_c)
    c_total = in_c + last_c

    b_tile = _choose_b_tile(N, L, l_out, target_lanes)
    num_tiles = -(-N // b_tile)
    n_pad = num_tiles * b_tile
    if n_pad != N:
        x = jnp.pad(x, ((0, n_pad - N), (0, 0), (0, 0)))
    BL = b_tile * L
    out_lanes = b_tile * l_out
    margin = 128
    assert max(abs(d) for (_, _, dl, _, _), (_, _, dlo, _) in plan
               for d in dl + dlo) <= margin

    # Layout plumbing (wrapper-side): batch goes into the lane dimension.
    xt = jnp.transpose(x, (1, 0, 2)).reshape(in_c, n_pad * L)
    lane_pos = jnp.asarray(
        np.tile(np.arange(L, dtype=np.int32), b_tile).reshape(1, BL))
    mm = np.arange(out_lanes)
    src_row = jnp.asarray(
        ((mm // l_out) * L + (mm % l_out) * pool_size).astype(np.int32)
        .reshape(1, out_lanes))

    kernel = functools.partial(
        _basic_block_kernel, plan=plan, in_c=in_c, seq_len=L, b_tile=b_tile,
        pool_size=pool_size, l_out=l_out, margin=margin)

    flops = 0
    for (_, rows_b, _, n_br, out_c), (_, rows_o, _, _) in plan:
        flops += 2 * n_br * out_c * rows_b * BL
        flops += 2 * out_c * rows_o * BL
    flops += 2 * c_total * BL * out_lanes * pool_size
    flops *= num_tiles
    bytes_accessed = int(
        (xt.size + w_slab.size + lane_pos.size + src_row.size
         + c_total * n_pad * l_out) * 4)

    out2d = pl.pallas_call(
        kernel,
        out_shape=jax.ShapeDtypeStruct((c_total, n_pad * l_out), x.dtype),
        grid_spec=pltpu.PrefetchScalarGridSpec(
            num_scalar_prefetch=0,
            grid=(num_tiles,),
            in_specs=[
                pl.BlockSpec((in_c, BL), lambda g: (0, g)),
                # constant-index operands: fetched once, VMEM-resident
                pl.BlockSpec(w_slab.shape, lambda g: (0, 0)),
                pl.BlockSpec((1, BL), lambda g: (0, 0)),
                pl.BlockSpec((1, out_lanes), lambda g: (0, 0)),
            ],
            out_specs=pl.BlockSpec((c_total, out_lanes), lambda g: (0, g)),
            scratch_shapes=[
                pltpu.VMEM((slab_rows, BL), jnp.float32),           # im2col slab
                pltpu.VMEM((max_tr, BL + 2 * margin), jnp.float32),  # staging
            ],
        ),
        compiler_params=pltpu.CompilerParams(
            dimension_semantics=("parallel",)),
        cost_estimate=pl.CostEstimate(flops=flops, transcendentals=0,
                                      bytes_accessed=bytes_accessed),
    )(xt, w_slab, lane_pos, src_row)

    out = out2d.reshape(c_total, n_pad, l_out).transpose(1, 0, 2)
    return out[:N]


# ---------------------------------------------------------------------------
# Parameter init (matches nn.Conv1d default uniform init shapes)
# ---------------------------------------------------------------------------
def init_comb_conv_layer(key, in_c, out_c, kernel_sizes, out_kernel_size):
    params = {'branches': [], 'kernel_sizes': list(kernel_sizes),
              'out_kernel_size': int(out_kernel_size)}
    keys = jax.random.split(key, 2 * len(kernel_sizes) + 2)
    ki = 0
    for K in kernel_sizes:
        bound = (in_c * K) ** -0.5
        w = jax.random.uniform(keys[ki], (out_c, in_c, K), jnp.float32,
                               -bound, bound); ki += 1
        b = jax.random.uniform(keys[ki], (out_c,), jnp.float32,
                               -bound, bound); ki += 1
        params['branches'].append((w, b))
    cat_c = in_c + len(kernel_sizes) * out_c
    bound = (cat_c * out_kernel_size) ** -0.5
    params['out_w'] = jax.random.uniform(
        keys[ki], (out_c, cat_c, out_kernel_size), jnp.float32, -bound, bound)
    ki += 1
    params['out_b'] = jax.random.uniform(keys[ki], (out_c,), jnp.float32,
                                         -bound, bound)
    return params


# ---------------------------------------------------------------------------
# Pure-JAX reference (correctness check)
# ---------------------------------------------------------------------------
def _conv1d_ref(x, w, b):
    y = lax.conv_general_dilated(x, w, (1,), 'VALID',
                                 dimension_numbers=('NCH', 'OIH', 'NCH'))
    return y + b.reshape(1, -1, 1)


def _comb_ref(x, params):
    outs = [x]
    for (w, b), K in zip(params['branches'], params['kernel_sizes']):
        outs.append(jnp.maximum(_conv1d_ref(_auto_pad_1d(x, K), w, b), 0.0))
    xc = jnp.concatenate(outs, axis=1)
    xp = _auto_pad_1d(xc, params['out_kernel_size'])
    return jnp.maximum(_conv1d_ref(xp, params['out_w'], params['out_b']), 0.0)


def _basic_block_ref(x, layer_params, pool_size):
    x1 = x
    for layer in layer_params:
        x1 = _comb_ref(x1, layer)
    xc = jnp.concatenate([x, x1], axis=1)
    N, C, L = xc.shape
    Lout = L // pool_size
    return jnp.max(xc[:, :, :Lout * pool_size].reshape(N, C, Lout, pool_size),
                   axis=-1)


# ---------------------------------------------------------------------------
if __name__ == "__main__":
    key = jax.random.PRNGKey(0)

    in_channels = 4
    layer_channels = [8, 8]
    comb_kernel_sizes = (3, 5)
    comb_out_kernel_size = 3
    pool_size = 2
    N, L = 32, 16            # 32 samples -> b_tile=16 (256 lanes), grid=(2,)

    k_x, k_p = jax.random.split(key)
    x = jax.random.normal(k_x, (N, in_channels, L), jnp.float32)

    in_cs = [in_channels] + layer_channels[:-1]
    layer_keys = jax.random.split(k_p, len(layer_channels))
    layer_params = [
        init_comb_conv_layer(lk, inc, outc, comb_kernel_sizes,
                             comb_out_kernel_size)
        for lk, inc, outc in zip(layer_keys, in_cs, layer_channels)
    ]

    out = basic_block_forward(x, layer_params, pool_size)
    out = jax.block_until_ready(out)

    ref = _basic_block_ref(x, layer_params, pool_size)
    expected_shape = (N, in_channels + layer_channels[-1], L // pool_size)
    assert out.shape == expected_shape, (out.shape, expected_shape)
    err = float(jnp.max(jnp.abs(out - ref)))
    assert err < 1e-4, err

    print("KERNEL_OK")
</pallas_src>

<mosaic_0001>
module attributes {stable_mosaic.version = 11 : i64} {
  func.func @_basic_block_kernel(%arg0: i32, %arg1: memref<4x256xf32, #tpu.memory_space<vmem>>, %arg2: memref<48x80xf32, #tpu.memory_space<vmem>>, %arg3: memref<1x256xi32, #tpu.memory_space<vmem>>, %arg4: memref<1x128xi32, #tpu.memory_space<vmem>>, %arg5: memref<12x128xf32, #tpu.memory_space<vmem>>, %arg6: memref<80x256xf32, #tpu.memory_space<vmem>>, %arg7: memref<24x512xf32, #tpu.memory_space<vmem>>) attributes {dimension_semantics = [#tpu.dimension_semantics<parallel>], iteration_bounds = array<i64: 2>, scalar_prefetch = 0 : i64, scratch_operands = 2 : i64, tpu.core_type = #tpu.core_type<tc>, window_params = [{transform_indices = @transform_0, window_bounds = array<i64: 4, 256>}, {pipeline_mode = #tpu.pipeline_mode<synchronous>, transform_indices = @transform_1, window_bounds = array<i64: 48, 80>}, {pipeline_mode = #tpu.pipeline_mode<synchronous>, transform_indices = @transform_2, window_bounds = array<i64: 1, 256>}, {pipeline_mode = #tpu.pipeline_mode<synchronous>, transform_indices = @transform_3, window_bounds = array<i64: 1, 128>}, {transform_indices = @transform_4, window_bounds = array<i64: 12, 128>}]} {
    %cst = arith.constant 0.000000e+00 : f32
    %0 = vector.broadcast %cst : f32 to vector<80x256xf32>
    %c0 = arith.constant 0 : index
    %c0_0 = arith.constant 0 : index
    %1 = vector.load %arg6[%c0, %c0_0] : memref<80x256xf32, #tpu.memory_space<vmem>>, vector<80x256xf32>
    tpu.vector_store %arg6[%c0, %c0_0], %0 {strides = array<i32>} : memref<80x256xf32, #tpu.memory_space<vmem>>, vector<80x256xf32>,
    %cst_1 = arith.constant 0.000000e+00 : f32
    %2 = vector.broadcast %cst_1 : f32 to vector<24x512xf32>
    %c0_2 = arith.constant 0 : index
    %c0_3 = arith.constant 0 : index
    %3 = vector.load %arg7[%c0_2, %c0_3] : memref<24x512xf32, #tpu.memory_space<vmem>>, vector<24x512xf32>
    tpu.vector_store %arg7[%c0_2, %c0_3], %2 {strides = array<i32>} : memref<24x512xf32, #tpu.memory_space<vmem>>, vector<24x512xf32>,
    %cst_4 = arith.constant 1.000000e+00 : f32
    %4 = vector.broadcast %cst_4 : f32 to vector<1x256xf32>
    %c0_5 = arith.constant 0 : index
    %c0_6 = arith.constant 0 : index
    %5 = vector.load %arg6[%c0_5, %c0_6] : memref<80x256xf32, #tpu.memory_space<vmem>>, vector<1x256xf32>
    tpu.vector_store %arg6[%c0_5, %c0_6], %4 {strides = array<i32>} : memref<80x256xf32, #tpu.memory_space<vmem>>, vector<1x256xf32>,
    %c0_7 = arith.constant 0 : index
    %c0_8 = arith.constant 0 : index
    %6 = vector.load %arg3[%c0_7, %c0_8] : memref<1x256xi32, #tpu.memory_space<vmem>>, vector<1x256xi32>
    %c0_9 = arith.constant 0 : index
    %c0_10 = arith.constant 0 : index
    %7 = vector.load %arg4[%c0_9, %c0_10] : memref<1x128xi32, #tpu.memory_space<vmem>>, vector<1x128xi32>
    %c0_11 = arith.constant 0 : index
    %c0_12 = arith.constant 0 : index
    %8 = vector.load %arg1[%c0_11, %c0_12] : memref<4x256xf32, #tpu.memory_space<vmem>>, vector<4x256xf32>
    %c0_13 = arith.constant 0 : index
    %c128 = arith.constant 128 : index
    %9 = vector.load %arg7[%c0_13, %c128] : memref<24x512xf32, #tpu.memory_space<vmem>>, vector<4x256xf32>
    tpu.vector_store %arg7[%c0_13, %c128], %8 {strides = array<i32>} : memref<24x512xf32, #tpu.memory_space<vmem>>, vector<4x256xf32>,
    %c0_14 = arith.constant 0 : index
    %c0_15 = arith.constant 0 : index
    %10 = vector.load %arg7[%c0_14, %c0_15] : memref<24x512xf32, #tpu.memory_space<vmem>>, vector<8x512xf32>
    %11 = vector.extract_strided_slice %10 {offsets = [0, 126], sizes = [8, 256], strides = [1, 1]} : vector<8x512xf32> to vector<8x256xf32>
    %c2_i32 = arith.constant 2 : i32
    %12 = vector.broadcast %c2_i32 : i32 to vector<1x256xi32>
    %13 = arith.cmpi sge, %6, %12 : vector<1x256xi32>
    %c16_i32 = arith.constant 16 : i32
    %14 = vector.broadcast %c16_i32 : i32 to vector<1x256xi32>
    %15 = arith.cmpi slt, %6, %14 : vector<1x256xi32>
    %16 = arith.andi %13, %15 : vector<1x256xi1>
    %cst_16 = arith.constant 0.000000e+00 : f32
    %17 = vector.shape_cast %16 : vector<1x256xi1> to vector<1x256xi1>
    %18 = vector.broadcast %17 : vector<1x256xi1> to vector<8x256xi1>
    %19 = vector.broadcast %cst_16 : f32 to vector<8x256xf32>
    %20 = arith.select %18, %11, %19 : vector<8x256xi1>, vector<8x256xf32>
    %c8 = arith.constant 8 : index
    %c0_17 = arith.constant 0 : index
    %21 = vector.load %arg6[%c8, %c0_17] : memref<80x256xf32, #tpu.memory_space<vmem>>, vector<8x256xf32>
    tpu.vector_store %arg6[%c8, %c0_17], %20 {strides = array<i32>} : memref<80x256xf32, #tpu.memory_space<vmem>>, vector<8x256xf32>,
    %22 = vector.extract_strided_slice %10 {offsets = [0, 127], sizes = [8, 256], strides = [1, 1]} : vector<8x512xf32> to vector<8x256xf32>
    %c1_i32 = arith.constant 1 : i32
    %23 = vector.broadcast %c1_i32 : i32 to vector<1x256xi32>
    %24 = arith.cmpi sge, %6, %23 : vector<1x256xi32>
    %c16_i32_18 = arith.constant 16 : i32
    %25 = vector.broadcast %c16_i32_18 : i32 to vector<1x256xi32>
    %26 = arith.cmpi slt, %6, %25 : vector<1x256xi32>
    %27 = arith.andi %24, %26 : vector<1x256xi1>
    %cst_19 = arith.constant 0.000000e+00 : f32
    %28 = vector.shape_cast %27 : vector<1x256xi1> to vector<1x256xi1>
    %29 = vector.broadcast %28 : vector<1x256xi1> to vector<8x256xi1>
    %30 = vector.broadcast %cst_19 : f32 to vector<8x256xf32>
    %31 = arith.select %29, %22, %30 : vector<8x256xi1>, vector<8x256xf32>
    %c16 = arith.constant 16 : index
    %c0_20 = arith.constant 0 : index
    %32 = vector.load %arg6[%c16, %c0_20] : memref<80x256xf32, #tpu.memory_space<vmem>>, vector<8x256xf32>
    tpu.vector_store %arg6[%c16, %c0_20], %31 {strides = array<i32>} : memref<80x256xf32, #tpu.memory_space<vmem>>, vector<8x256xf32>,
    %33 = vector.extract_strided_slice %10 {offsets = [0, 128], sizes = [8, 256], strides = [1, 1]} : vector<8x512xf32> to vector<8x256xf32>
    %c24 = arith.constant 24 : index
    %c0_21 = arith.constant 0 : index
    %34 = vector.load %arg6[%c24, %c0_21] : memref<80x256xf32, #tpu.memory_space<vmem>>, vector<8x256xf32>
    tpu.vector_store %arg6[%c24, %c0_21], %33 {strides = array<i32>} : memref<80x256xf32, #tpu.memory_space<vmem>>, vector<8x256xf32>,
    %35 = vector.extract_strided_slice %10 {offsets = [0, 129], sizes = [8, 256], strides = [1, 1]} : vector<8x512xf32> to vector<8x256xf32>
    %c0_i32 = arith.constant 0 : i32
    %36 = vector.broadcast %c0_i32 : i32 to vector<1x256xi32>
    %37 = arith.cmpi sge, %6, %36 : vector<1x256xi32>
    %c15_i32 = arith.constant 15 : i32
    %38 = vector.broadcast %c15_i32 : i32 to vector<1x256xi32>
    %39 = arith.cmpi slt, %6, %38 : vector<1x256xi32>
    %40 = arith.andi %37, %39 : vector<1x256xi1>
    %cst_22 = arith.constant 0.000000e+00 : f32
    %41 = vector.shape_cast %40 : vector<1x256xi1> to vector<1x256xi1>
    %42 = vector.broadcast %41 : vector<1x256xi1> to vector<8x256xi1>
    %43 = vector.broadcast %cst_22 : f32 to vector<8x256xf32>
    %44 = arith.select %42, %35, %43 : vector<8x256xi1>, vector<8x256xf32>
    %c32 = arith.constant 32 : index
    %c0_23 = arith.constant 0 : index
    %45 = vector.load %arg6[%c32, %c0_23] : memref<80x256xf32, #tpu.memory_space<vmem>>, vector<8x256xf32>
    tpu.vector_store %arg6[%c32, %c0_23], %44 {strides = array<i32>} : memref<80x256xf32, #tpu.memory_space<vmem>>, vector<8x256xf32>,
    %46 = vector.extract_strided_slice %10 {offsets = [0, 130], sizes = [8, 256], strides = [1, 1]} : vector<8x512xf32> to vector<8x256xf32>
    %c0_i32_24 = arith.constant 0 : i32
    %47 = vector.broadcast %c0_i32_24 : i32 to vector<1x256xi32>
    %48 = arith.cmpi sge, %6, %47 : vector<1x256xi32>
    %c14_i32 = arith.constant 14 : i32
    %49 = vector.broadcast %c14_i32 : i32 to vector<1x256xi32>
    %50 = arith.cmpi slt, %6, %49 : vector<1x256xi32>
    %51 = arith.andi %48, %50 : vector<1x256xi1>
    %cst_25 = arith.constant 0.000000e+00 : f32
    %52 = vector.shape_cast %51 : vector<1x256xi1> to vector<1x256xi1>
    %53 = vector.broadcast %52 : vector<1x256xi1> to vector<8x256xi1>
    %54 = vector.broadcast %cst_25 : f32 to vector<8x256xf32>
    %55 = arith.select %53, %46, %54 : vector<8x256xi1>, vector<8x256xf32>
    %c40 = arith.constant 40 : index
    %c0_26 = arith.constant 0 : index
    %56 = vector.load %arg6[%c40, %c0_26] : memref<80x256xf32, #tpu.memory_space<vmem>>, vector<8x256xf32>
    tpu.vector_store %arg6[%c40, %c0_26], %55 {strides = array<i32>} : memref<80x256xf32, #tpu.memory_space<vmem>>, vector<8x256xf32>,
    %c0_27 = arith.constant 0 : index
    %c0_28 = arith.constant 0 : index
    %57 = vector.load %arg2[%c0_27, %c0_28] : memref<48x80xf32, #tpu.memory_space<vmem>>, vector<16x48xf32>
    %c0_29 = arith.constant 0 : index
    %c0_30 = arith.constant 0 : index
    %58 = vector.load %arg6[%c0_29, %c0_30] : memref<80x256xf32, #tpu.memory_space<vmem>>, vector<48x256xf32>
    %cst_31 = arith.constant dense<0.000000e+00> : vector<16x256xf32>
    %59 = tpu.matmul %57, %58, %cst_31 {dimension_numbers = #tpu.dot_dimension_numbers<[1], [0], [0], [1], [0, 0, 1, 1], [], []>} : vector<16x48xf32>, vector<48x256xf32>, vector<16x256xf32> -> vector<16x256xf32>
    %cst_32 = arith.constant 0.000000e+00 : f32
    %60 = vector.broadcast %cst_32 : f32 to vector<16x256xf32>
    %61 = arith.maximumf %59, %60 : vector<16x256xf32>
    %62 = vector.extract_strided_slice %61 {offsets = [0, 0], sizes = [8, 256], strides = [1, 1]} : vector<16x256xf32> to vector<8x256xf32>
    %63 = vector.extract_strided_slice %61 {offsets = [8, 0], sizes = [8, 256], strides = [1, 1]} : vector<16x256xf32> to vector<8x256xf32>
    %c0_33 = arith.constant 0 : index
    %c128_34 = arith.constant 128 : index
    %64 = vector.load %arg7[%c0_33, %c128_34] : memref<24x512xf32, #tpu.memory_space<vmem>>, vector<4x256xf32>
    tpu.vector_store %arg7[%c0_33, %c128_34], %8 {strides = array<i32>} : memref<24x512xf32, #tpu.memory_space<vmem>>, vector<4x256xf32>,
    %c8_35 = arith.constant 8 : index
    %c128_36 = arith.constant 128 : index
    %65 = vector.load %arg7[%c8_35, %c128_36] : memref<24x512xf32, #tpu.memory_space<vmem>>, vector<8x256xf32>
    tpu.vector_store %arg7[%c8_35, %c128_36], %62 {strides = array<i32>} : memref<24x512xf32, #tpu.memory_space<vmem>>, vector<8x256xf32>,
    %c16_37 = arith.constant 16 : index
    %c128_38 = arith.constant 128 : index
    %66 = vector.load %arg7[%c16_37, %c128_38] : memref<24x512xf32, #tpu.memory_space<vmem>>, vector<8x256xf32>
    tpu.vector_store %arg7[%c16_37, %c128_38], %63 {strides = array<i32>} : memref<24x512xf32, #tpu.memory_space<vmem>>, vector<8x256xf32>,
    %c0_39 = arith.constant 0 : index
    %c0_40 = arith.constant 0 : index
    %67 = vector.load %arg7[%c0_39, %c0_40] : memref<24x512xf32, #tpu.memory_space<vmem>>, vector<24x512xf32>
    %68 = vector.extract_strided_slice %67 {offsets = [0, 127], sizes = [24, 256], strides = [1, 1]} : vector<24x512xf32> to vector<24x256xf32>
    %c1_i32_41 = arith.constant 1 : i32
    %69 = vector.broadcast %c1_i32_41 : i32 to vector<1x256xi32>
    %70 = arith.cmpi sge, %6, %69 : vector<1x256xi32>
    %c16_i32_42 = arith.constant 16 : i32
    %71 = vector.broadcast %c16_i32_42 : i32 to vector<1x256xi32>
    %72 = arith.cmpi slt, %6, %71 : vector<1x256xi32>
    %73 = arith.andi %70, %72 : vector<1x256xi1>
    %cst_43 = arith.constant 0.000000e+00 : f32
    %74 = vector.shape_cast %73 : vector<1x256xi1> to vector<1x256xi1>
    %75 = vector.broadcast %74 : vector<1x256xi1> to vector<24x256xi1>
    %76 = vector.broadcast %cst_43 : f32 to vector<24x256xf32>
    %77 = arith.select %75, %68, %76 : vector<24x256xi1>, vector<24x256xf32>
    %c8_44 = arith.constant 8 : index
    %c0_45 = arith.constant 0 : index
    %78 = vector.load %arg6[%c8_44, %c0_45] : memref<80x256xf32, #tpu.memory_space<vmem>>, vector<24x256xf32>
    tpu.vector_store %arg6[%c8_44, %c0_45], %77 {strides = array<i32>} : memref<80x256xf32, #tpu.memory_space<vmem>>, vector<24x256xf32>,
    %79 = vector.extract_strided_slice %67 {offsets = [0, 128], sizes = [24, 256], strides = [1, 1]} : vector<24x512xf32> to vector<24x256xf32>
    %c32_46 = arith.constant 32 : index
    %c0_47 = arith.constant 0 : index
    %80 = vector.load %arg6[%c32_46, %c0_47] : memref<80x256xf32, #tpu.memory_space<vmem>>, vector<24x256xf32>
    tpu.vector_store %arg6[%c32_46, %c0_47], %79 {strides = array<i32>} : memref<80x256xf32, #tpu.memory_space<vmem>>, vector<24x256xf32>,
    %81 = vector.extract_strided_slice %67 {offsets = [0, 129], sizes = [24, 256], strides = [1, 1]} : vector<24x512xf32> to vector<24x256xf32>
    %c0_i32_48 = arith.constant 0 : i32
    %82 = vector.broadcast %c0_i32_48 : i32 to vector<1x256xi32>
    %83 = arith.cmpi sge, %6, %82 : vector<1x256xi32>
    %c15_i32_49 = arith.constant 15 : i32
    %84 = vector.broadcast %c15_i32_49 : i32 to vector<1x256xi32>
    %85 = arith.cmpi slt, %6, %84 : vector<1x256xi32>
    %86 = arith.andi %83, %85 : vector<1x256xi1>
    %cst_50 = arith.constant 0.000000e+00 : f32
    %87 = vector.shape_cast %86 : vector<1x256xi1> to vector<1x256xi1>
    %88 = vector.broadcast %87 : vector<1x256xi1> to vector<24x256xi1>
    %89 = vector.broadcast %cst_50 : f32 to vector<24x256xf32>
    %90 = arith.select %88, %81, %89 : vector<24x256xi1>, vector<24x256xf32>
    %c56 = arith.constant 56 : index
    %c0_51 = arith.constant 0 : index
    %91 = vector.load %arg6[%c56, %c0_51] : memref<80x256xf32, #tpu.memory_space<vmem>>, vector<24x256xf32>
    tpu.vector_store %arg6[%c56, %c0_51], %90 {strides = array<i32>} : memref<80x256xf32, #tpu.memory_space<vmem>>, vector<24x256xf32>,
    %c16_52 = arith.constant 16 : index
    %c0_53 = arith.constant 0 : index
    %92 = vector.load %arg2[%c16_52, %c0_53] : memref<48x80xf32, #tpu.memory_space<vmem>>, vector<8x80xf32>
    %c0_54 = arith.constant 0 : index
    %c0_55 = arith.constant 0 : index
    %93 = vector.load %arg6[%c0_54, %c0_55] : memref<80x256xf32, #tpu.memory_space<vmem>>, vector<80x256xf32>
    %cst_56 = arith.constant dense<0.000000e+00> : vector<8x256xf32>
    %94 = tpu.matmul %92, %93, %cst_56 {dimension_numbers = #tpu.dot_dimension_numbers<[1], [0], [0], [1], [0, 0, 1, 1], [], []>} : vector<8x80xf32>, vector<80x256xf32>, vector<8x256xf32> -> vector<8x256xf32>
    %cst_57 = arith.constant 0.000000e+00 : f32
    %95 = vector.broadcast %cst_57 : f32 to vector<8x256xf32>
    %96 = arith.maximumf %94, %95 : vector<8x256xf32>
    %c0_58 = arith.constant 0 : index
    %c128_59 = arith.constant 128 : index
    %97 = vector.load %arg7[%c0_58, %c128_59] : memref<24x512xf32, #tpu.memory_space<vmem>>, vector<8x256xf32>
    tpu.vector_store %arg7[%c0_58, %c128_59], %96 {strides = array<i32>} : memref<24x512xf32, #tpu.memory_space<vmem>>, vector<8x256xf32>,
    %c0_60 = arith.constant 0 : index
    %c0_61 = arith.constant 0 : index
    %98 = vector.load %arg7[%c0_60, %c0_61] : memref<24x512xf32, #tpu.memory_space<vmem>>, vector<8x512xf32>
    %99 = vector.extract_strided_slice %98 {offsets = [0, 126], sizes = [8, 256], strides = [1, 1]} : vector<8x512xf32> to vector<8x256xf32>
    %c2_i32_62 = arith.constant 2 : i32
    %100 = vector.broadcast %c2_i32_62 : i32 to vector<1x256xi32>
    %101 = arith.cmpi sge, %6, %100 : vector<1x256xi32>
    %c16_i32_63 = arith.constant 16 : i32
    %102 = vector.broadcast %c16_i32_63 : i32 to vector<1x256xi32>
    %103 = arith.cmpi slt, %6, %102 : vector<1x256xi32>
    %104 = arith.andi %101, %103 : vector<1x256xi1>
    %cst_64 = arith.constant 0.000000e+00 : f32
    %105 = vector.shape_cast %104 : vector<1x256xi1> to vector<1x256xi1>
    %106 = vector.broadcast %105 : vector<1x256xi1> to vector<8x256xi1>
    %107 = vector.broadcast %cst_64 : f32 to vector<8x256xf32>
    %108 = arith.select %106, %99, %107 : vector<8x256xi1>, vector<8x256xf32>
    %c8_65 = arith.constant 8 : index
    %c0_66 = arith.constant 0 : index
    %109 = vector.load %arg6[%c8_65, %c0_66] : memref<80x256xf32, #tpu.memory_space<vmem>>, vector<8x256xf32>
    tpu.vector_store %arg6[%c8_65, %c0_66], %108 {strides = array<i32>} : memref<80x256xf32, #tpu.memory_space<vmem>>, vector<8x256xf32>,
    %110 = vector.extract_strided_slice %98 {offsets = [0, 127], sizes = [8, 256], strides = [1, 1]} : vector<8x512xf32> to vector<8x256xf32>
    %c1_i32_67 = arith.constant 1 : i32
    %111 = vector.broadcast %c1_i32_67 : i32 to vector<1x256xi32>
    %112 = arith.cmpi sge, %6, %111 : vector<1x256xi32>
    %c16_i32_68 = arith.constant 16 : i32
    %113 = vector.broadcast %c16_i32_68 : i32 to vector<1x256xi32>
    %114 = arith.cmpi slt, %6, %113 : vector<1x256xi32>
    %115 = arith.andi %112, %114 : vector<1x256xi1>
    %cst_69 = arith.constant 0.000000e+00 : f32
    %116 = vector.shape_cast %115 : vector<1x256xi1> to vector<1x256xi1>
    %117 = vector.broadcast %116 : vector<1x256xi1> to vector<8x256xi1>
    %118 = vector.broadcast %cst_69 : f32 to vector<8x256xf32>
    %119 = arith.select %117, %110, %118 : vector<8x256xi1>, vector<8x256xf32>
    %c16_70 = arith.constant 16 : index
    %c0_71 = arith.constant 0 : index
    %120 = vector.load %arg6[%c16_70, %c0_71] : memref<80x256xf32, #tpu.memory_space<vmem>>, vector<8x256xf32>
    tpu.vector_store %arg6[%c16_70, %c0_71], %119 {strides = array<i32>} : memref<80x256xf32, #tpu.memory_space<vmem>>, vector<8x256xf32>,
    %121 = vector.extract_strided_slice %98 {offsets = [0, 128], sizes = [8, 256], strides = [1, 1]} : vector<8x512xf32> to vector<8x256xf32>
    %c24_72 = arith.constant 24 : index
    %c0_73 = arith.constant 0 : index
    %122 = vector.load %arg6[%c24_72, %c0_73] : memref<80x256xf32, #tpu.memory_space<vmem>>, vector<8x256xf32>
    tpu.vector_store %arg6[%c24_72, %c0_73], %121 {strides = array<i32>} : memref<80x256xf32, #tpu.memory_space<vmem>>, vector<8x256xf32>,
    %123 = vector.extract_strided_slice %98 {offsets = [0, 129], sizes = [8, 256], strides = [1, 1]} : vector<8x512xf32> to vector<8x256xf32>
    %c0_i32_74 = arith.constant 0 : i32
    %124 = vector.broadcast %c0_i32_74 : i32 to vector<1x256xi32>
    %125 = arith.cmpi sge, %6, %124 : vector<1x256xi32>
    %c15_i32_75 = arith.constant 15 : i32
    %126 = vector.broadcast %c15_i32_75 : i32 to vector<1x256xi32>
    %127 = arith.cmpi slt, %6, %126 : vector<1x256xi32>
    %128 = arith.andi %125, %127 : vector<1x256xi1>
    %cst_76 = arith.constant 0.000000e+00 : f32
    %129 = vector.shape_cast %128 : vector<1x256xi1> to vector<1x256xi1>
    %130 = vector.broadcast %129 : vector<1x256xi1> to vector<8x256xi1>
    %131 = vector.broadcast %cst_76 : f32 to vector<8x256xf32>
    %132 = arith.select %130, %123, %131 : vector<8x256xi1>, vector<8x256xf32>
    %c32_77 = arith.constant 32 : index
    %c0_78 = arith.constant 0 : index
    %133 = vector.load %arg6[%c32_77, %c0_78] : memref<80x256xf32, #tpu.memory_space<vmem>>, vector<8x256xf32>
    tpu.vector_store %arg6[%c32_77, %c0_78], %132 {strides = array<i32>} : memref<80x256xf32, #tpu.memory_space<vmem>>, vector<8x256xf32>,
    %134 = vector.extract_strided_slice %98 {offsets = [0, 130], sizes = [8, 256], strides = [1, 1]} : vector<8x512xf32> to vector<8x256xf32>
    %c0_i32_79 = arith.constant 0 : i32
    %135 = vector.broadcast %c0_i32_79 : i32 to vector<1x256xi32>
    %136 = arith.cmpi sge, %6, %135 : vector<1x256xi32>
    %c14_i32_80 = arith.constant 14 : i32
    %137 = vector.broadcast %c14_i32_80 : i32 to vector<1x256xi32>
    %138 = arith.cmpi slt, %6, %137 : vector<1x256xi32>
    %139 = arith.andi %136, %138 : vector<1x256xi1>
    %cst_81 = arith.constant 0.000000e+00 : f32
    %140 = vector.shape_cast %139 : vector<1x256xi1> to vector<1x256xi1>
    %141 = vector.broadcast %140 : vector<1x256xi1> to vector<8x256xi1>
    %142 = vector.broadcast %cst_81 : f32 to vector<8x256xf32>
    %143 = arith.select %141, %134, %142 : vector<8x256xi1>, vector<8x256xf32>
    %c40_82 = arith.constant 40 : index
    %c0_83 = arith.constant 0 : index
    %144 = vector.load %arg6[%c40_82, %c0_83] : memref<80x256xf32, #tpu.memory_space<vmem>>, vector<8x256xf32>
    tpu.vector_store %arg6[%c40_82, %c0_83], %143 {strides = array<i32>} : memref<80x256xf32, #tpu.memory_space<vmem>>, vector<8x256xf32>,
    %c24_84 = arith.constant 24 : index
    %c0_85 = arith.constant 0 : index
    %145 = vector.load %arg2[%c24_84, %c0_85] : memref<48x80xf32, #tpu.memory_space<vmem>>, vector<16x48xf32>
    %c0_86 = arith.constant 0 : index
    %c0_87 = arith.constant 0 : index
    %146 = vector.load %arg6[%c0_86, %c0_87] : memref<80x256xf32, #tpu.memory_space<vmem>>, vector<48x256xf32>
    %cst_88 = arith.constant dense<0.000000e+00> : vector<16x256xf32>
    %147 = tpu.matmul %145, %146, %cst_88 {dimension_numbers = #tpu.dot_dimension_numbers<[1], [0], [0], [1], [0, 0, 1, 1], [], []>} : vector<16x48xf32>, vector<48x256xf32>, vector<16x256xf32> -> vector<16x256xf32>
    %cst_89 = arith.constant 0.000000e+00 : f32
    %148 = vector.broadcast %cst_89 : f32 to vector<16x256xf32>
    %149 = arith.maximumf %147, %148 : vector<16x256xf32>
    %150 = vector.extract_strided_slice %149 {offsets = [0, 0], sizes = [8, 256], strides = [1, 1]} : vector<16x256xf32> to vector<8x256xf32>
    %151 = vector.extract_strided_slice %149 {offsets = [8, 0], sizes = [8, 256], strides = [1, 1]} : vector<16x256xf32> to vector<8x256xf32>
    %c0_90 = arith.constant 0 : index
    %c128_91 = arith.constant 128 : index
    %152 = vector.load %arg7[%c0_90, %c128_91] : memref<24x512xf32, #tpu.memory_space<vmem>>, vector<8x256xf32>
    tpu.vector_store %arg7[%c0_90, %c128_91], %96 {strides = array<i32>} : memref<24x512xf32, #tpu.memory_space<vmem>>, vector<8x256xf32>,
    %c8_92 = arith.constant 8 : index
    %c128_93 = arith.constant 128 : index
    %153 = vector.load %arg7[%c8_92, %c128_93] : memref<24x512xf32, #tpu.memory_space<vmem>>, vector<8x256xf32>
    tpu.vector_store %arg7[%c8_92, %c128_93], %150 {strides = array<i32>} : memref<24x512xf32, #tpu.memory_space<vmem>>, vector<8x256xf32>,
    %c16_94 = arith.constant 16 : index
    %c128_95 = arith.constant 128 : index
    %154 = vector.load %arg7[%c16_94, %c128_95] : memref<24x512xf32, #tpu.memory_space<vmem>>, vector<8x256xf32>
    tpu.vector_store %arg7[%c16_94, %c128_95], %151 {strides = array<i32>} : memref<24x512xf32, #tpu.memory_space<vmem>>, vector<8x256xf32>,
    %c0_96 = arith.constant 0 : index
    %c0_97 = arith.constant 0 : index
    %155 = vector.load %arg7[%c0_96, %c0_97] : memref<24x512xf32, #tpu.memory_space<vmem>>, vector<24x512xf32>
    %156 = vector.extract_strided_slice %155 {offsets = [0, 127], sizes = [24, 256], strides = [1, 1]} : vector<24x512xf32> to vector<24x256xf32>
    %c1_i32_98 = arith.constant 1 : i32
    %157 = vector.broadcast %c1_i32_98 : i32 to vector<1x256xi32>
    %158 = arith.cmpi sge, %6, %157 : vector<1x256xi32>
    %c16_i32_99 = arith.constant 16 : i32
    %159 = vector.broadcast %c16_i32_99 : i32 to vector<1x256xi32>
    %160 = arith.cmpi slt, %6, %159 : vector<1x256xi32>
    %161 = arith.andi %158, %160 : vector<1x256xi1>
    %cst_100 = arith.constant 0.000000e+00 : f32
    %162 = vector.shape_cast %161 : vector<1x256xi1> to vector<1x256xi1>
    %163 = vector.broadcast %162 : vector<1x256xi1> to vector<24x256xi1>
    %164 = vector.broadcast %cst_100 : f32 to vector<24x256xf32>
    %165 = arith.select %163, %156, %164 : vector<24x256xi1>, vector<24x256xf32>
    %c8_101 = arith.constant 8 : index
    %c0_102 = arith.constant 0 : index
    %166 = vector.load %arg6[%c8_101, %c0_102] : memref<80x256xf32, #tpu.memory_space<vmem>>, vector<24x256xf32>
    tpu.vector_store %arg6[%c8_101, %c0_102], %165 {strides = array<i32>} : memref<80x256xf32, #tpu.memory_space<vmem>>, vector<24x256xf32>,
    %167 = vector.extract_strided_slice %155 {offsets = [0, 128], sizes = [24, 256], strides = [1, 1]} : vector<24x512xf32> to vector<24x256xf32>
    %c32_103 = arith.constant 32 : index
    %c0_104 = arith.constant 0 : index
    %168 = vector.load %arg6[%c32_103, %c0_104] : memref<80x256xf32, #tpu.memory_space<vmem>>, vector<24x256xf32>
    tpu.vector_store %arg6[%c32_103, %c0_104], %167 {strides = array<i32>} : memref<80x256xf32, #tpu.memory_space<vmem>>, vector<24x256xf32>,
    %169 = vector.extract_strided_slice %155 {offsets = [0, 129], sizes = [24, 256], strides = [1, 1]} : vector<24x512xf32> to vector<24x256xf32>
    %c0_i32_105 = arith.constant 0 : i32
    %170 = vector.broadcast %c0_i32_105 : i32 to vector<1x256xi32>
    %171 = arith.cmpi sge, %6, %170 : vector<1x256xi32>
    %c15_i32_106 = arith.constant 15 : i32
    %172 = vector.broadcast %c15_i32_106 : i32 to vector<1x256xi32>
    %173 = arith.cmpi slt, %6, %172 : vector<1x256xi32>
    %174 = arith.andi %171, %173 : vector<1x256xi1>
    %cst_107 = arith.constant 0.000000e+00 : f32
    %175 = vector.shape_cast %174 : vector<1x256xi1> to vector<1x256xi1>
    %176 = vector.broadcast %175 : vector<1x256xi1> to vector<24x256xi1>
    %177 = vector.broadcast %cst_107 : f32 to vector<24x256xf32>
    %178 = arith.select %176, %169, %177 : vector<24x256xi1>, vector<24x256xf32>
    %c56_108 = arith.constant 56 : index
    %c0_109 = arith.constant 0 : index
    %179 = vector.load %arg6[%c56_108, %c0_109] : memref<80x256xf32, #tpu.memory_space<vmem>>, vector<24x256xf32>
    tpu.vector_store %arg6[%c56_108, %c0_109], %178 {strides = array<i32>} : memref<80x256xf32, #tpu.memory_space<vmem>>, vector<24x256xf32>,
    %c40_110 = arith.constant 40 : index
    %c0_111 = arith.constant 0 : index
    %180 = vector.load %arg2[%c40_110, %c0_111] : memref<48x80xf32, #tpu.memory_space<vmem>>, vector<8x80xf32>
    %c0_112 = arith.constant 0 : index
    %c0_113 = arith.constant 0 : index
    %181 = vector.load %arg6[%c0_112, %c0_113] : memref<80x256xf32, #tpu.memory_space<vmem>>, vector<80x256xf32>
    %cst_114 = arith.constant dense<0.000000e+00> : vector<8x256xf32>
    %182 = tpu.matmul %180, %181, %cst_114 {dimension_numbers = #tpu.dot_dimension_numbers<[1], [0], [0], [1], [0, 0, 1, 1], [], []>} : vector<8x80xf32>, vector<80x256xf32>, vector<8x256xf32> -> vector<8x256xf32>
    %cst_115 = arith.constant 0.000000e+00 : f32
    %183 = vector.broadcast %cst_115 : f32 to vector<8x256xf32>
    %184 = arith.maximumf %182, %183 : vector<8x256xf32>
    %185 = tpu.iota {dimensions = array<i32: 0>} : vector<256x128xi32>
    %c0_i32_116 = arith.constant 0 : i32
    %186 = vector.broadcast %c0_i32_116 : i32 to vector<1x128xi32>
    %187 = arith.addi %7, %186 : vector<1x128xi32>
    %188 = vector.broadcast %187 : vector<1x128xi32> to vector<256x128xi32>
    %189 = arith.cmpi eq, %185, %188 : vector<256x128xi32>
    %190 = arith.extui %189 : vector<256x128xi1> to vector<256x128xi32>
    %191 = arith.sitofp %190 : vector<256x128xi32> to vector<256x128xf32>
    %c1_i32_117 = arith.constant 1 : i32
    %192 = vector.broadcast %c1_i32_117 : i32 to vector<1x128xi32>
    %193 = arith.addi %7, %192 : vector<1x128xi32>
    %194 = vector.broadcast %193 : vector<1x128xi32> to vector<256x128xi32>
    %195 = arith.cmpi eq, %185, %194 : vector<256x128xi32>
    %196 = arith.extui %195 : vector<256x128xi1> to vector<256x128xi32>
    %197 = arith.sitofp %196 : vector<256x128xi32> to vector<256x128xf32>
    %cst_118 = arith.constant dense<0.000000e+00> : vector<4x128xf32>
    %198 = tpu.matmul %8, %191, %cst_118 {dimension_numbers = #tpu.dot_dimension_numbers<[1], [0], [0], [1], [0, 0, 1, 1], [], []>} : vector<4x256xf32>, vector<256x128xf32>, vector<4x128xf32> -> vector<4x128xf32>
    %cst_119 = arith.constant dense<0.000000e+00> : vector<4x128xf32>
    %199 = tpu.matmul %8, %197, %cst_119 {dimension_numbers = #tpu.dot_dimension_numbers<[1], [0], [0], [1], [0, 0, 1, 1], [], []>} : vector<4x256xf32>, vector<256x128xf32>, vector<4x128xf32> -> vector<4x128xf32>
    %200 = arith.maximumf %198, %199 : vector<4x128xf32>
    %c0_120 = arith.constant 0 : index
    %c0_121 = arith.constant 0 : index
    %201 = vector.load %arg5[%c0_120, %c0_121] : memref<12x128xf32, #tpu.memory_space<vmem>>, vector<4x128xf32>
    tpu.vector_store %arg5[%c0_120, %c0_121], %200 {strides = array<i32>} : memref<12x128xf32, #tpu.memory_space<vmem>>, vector<4x128xf32>,
    %cst_122 = arith.constant dense<0.000000e+00> : vector<8x128xf32>
    %202 = tpu.matmul %184, %191, %cst_122 {dimension_numbers = #tpu.dot_dimension_numbers<[1], [0], [0], [1], [0, 0, 1, 1], [], []>} : vector<8x256xf32>, vector<256x128xf32>, vector<8x128xf32> -> vector<8x128xf32>
    %cst_123 = arith.constant dense<0.000000e+00> : vector<8x128xf32>
    %203 = tpu.matmul %184, %197, %cst_123 {dimension_numbers = #tpu.dot_dimension_numbers<[1], [0], [0], [1], [0, 0, 1, 1], [], []>} : vector<8x256xf32>, vector<256x128xf32>, vector<8x128xf32> -> vector<8x128xf32>
    %204 = arith.maximumf %202, %203 : vector<8x128xf32>
    %c4 = arith.constant 4 : index
    %c0_124 = arith.constant 0 : index
    %205 = vector.load %arg5[%c4, %c0_124] : memref<12x128xf32, #tpu.memory_space<vmem>>, vector<8x128xf32>
    tpu.vector_store %arg5[%c4, %c0_124], %204 {strides = array<i32>} : memref<12x128xf32, #tpu.memory_space<vmem>>, vector<8x128xf32>,
    return
  }
  func.func @transform_0(%arg0: i32) -> (i32, i32) {
    %c0_i32 = arith.constant 0 : i32
    %c0_i32_0 = arith.constant 0 : i32
    return %c0_i32, %arg0 : i32, i32
  }
  func.func @transform_1(%arg0: i32) -> (i32, i32) {
    %c0_i32 = arith.constant 0 : i32
    %c0_i32_0 = arith.constant 0 : i32
    %c0_i32_1 = arith.constant 0 : i32
    return %c0_i32, %c0_i32_0 : i32, i32
  }
  func.func @transform_2(%arg0: i32) -> (i32, i32) {
    %c0_i32 = arith.constant 0 : i32
    %c0_i32_0 = arith.constant 0 : i32
    %c0_i32_1 = arith.constant 0 : i32
    return %c0_i32, %c0_i32_0 : i32, i32
  }
  func.func @transform_3(%arg0: i32) -> (i32, i32) {
    %c0_i32 = arith.constant 0 : i32
    %c0_i32_0 = arith.constant 0 : i32
    %c0_i32_1 = arith.constant 0 : i32
    return %c0_i32, %c0_i32_0 : i32, i32
  }
  func.func @transform_4(%arg0: i32) -> (i32, i32) {
    %c0_i32 = arith.constant 0 : i32
    %c0_i32_0 = arith.constant 0 : i32
    return %c0_i32, %arg0 : i32, i32
  }
}

</mosaic_0001>

<bundles_post_ra>
// kernel: tpu_custom_call.1
= control target key start
LH: loop header
LB: loop body
LE: loop exit
PB: predicated region body
PF: predicated region fallthrough
CT: control target
= control target key end

     0   :  { %9 = vsyncpa [#allocation5], 0  ;;  %s3733_s0 = inlined_call_operand.hbm [shape: f32[4,512], index: 0, kind: input, shape index: {}]   ;;  %s3734_s1 = inlined_call_operand.hbm [shape: f32[48,80], index: 1, kind: input, shape index: {}]   ;;  %s3735_s2 = inlined_call_operand.vmem [shape: s32[1,256], index: 2, kind: input, shape index: {}]   ;;  %s3736_s3 = inlined_call_operand.vmem [shape: s32[1,128], index: 3, kind: input, shape index: {}]   ;;  %s3737_s4 = inlined_call_operand.hbm [shape: f32[12,256], index: 4, kind: output, shape index: {}]  }
   0x1   :  { %11 = vsyncpa [#allocation5 + $0x1], 0 }
   0x2   :  { %12 = vsyncpa [#allocation8], 0 }
   0x3   :  { %13 = vsyncpa [#allocation6], 0 }
   0x4   :  { %15 = vsyncpa [#allocation6 + $0x1], 0  ;;  %s2593_s15 = smov 0   ;;  %s2595_s16 = smov 0  }
   0x5   :  { %s2597_s17 = smov 0   ;;  %s2599_s18 = smov 0  }
   0x6 LB: > { %s2614_s19 = sadd.s32 4294967295, %s2549_s18   ;;  %s1720_s20 = sadd.s32 4294967294, %s2549_s18   ;;  %s2549_s18 = sphi %s2599_s18, %s3984_s18   ;;  %s2545_s17 = sphi %s2597_s17, %s3983_s17   ;;  %s2541_s16 = sphi %s2595_s16, %s3982_s16   ;;  %s2537_s15 = sphi %s2593_s15, %s3981_s15  }
   0x7   : > { %p41_p0 = scmp.ne.s32.totalorder %s2541_s16, %s2537_s15  ;;  %p3738_p1 = scmp.eq.s32.totalorder %s2614_s19, 0 }
   0x8   : > { %p134_p3 = scmp.eq.s32.totalorder %s1720_s20, 1  ;;  %p1721_p5 = scmp.ge.s32.totalorder %s2549_s18, 1 }
   0x9   : > { %p2623_p4 = por %p3738_p1, %p41_p0  ;;  %p141_p7 = scmp.lt.s32.totalorder %s2549_s18, 3 }
   0xa   : > { %p2628_p6 = por %p134_p3, %p41_p0  ;;  %s2551_s24 = smov [#allocation7]  }
   0xb   : > { %s3787_s21 = scalar_select %p2623_p4, 1, 0 }
   0xc   : > { %s3788_s22 = scalar_select %p2628_p6, 1, 0 }
   0xd   : > { %p2633_p8 = pnand %p1721_p5, %p141_p7  ;;  %s153_s25 = sshll.u32 %s2551_s24, 4  ;;  %s2637_s25 = int_to_ptr.vmem [resolvable:$true] %s153_s25 }
   0xe   : > { %s2649_s27 = sadd.s32 1, %s2549_s18   ;;  %s28_s28 = sadd.s32 1, %s2545_s17 }
   0xf   : > { %s3789_s23 = scalar_select %p2633_p8, 1, 0 }
  0x10   : > { %p2274_p9 = pneg %p2633_p8  ;;  %s25_s29 = ssub.s32 %s2549_s18, %s2649_s27 }
  0x11   : > { %s2421_s6 = scalar_lea.hbm %s3734_s1, 768 }
  0x12   : > { %p2644_p11 = pnand %p2274_p9, %p3738_p1  ;;  %p2422_p12 = scmp.ne.s32.totalorder %s3734_s1, %s2421_s6 }
  0x13   : > { %p2428_p5 = scmp.lt.u32.totalorder %s2421_s6, %s3734_s1 }
  0x14   : > { %p2423_p13 = pneg %p2644_p11 }
  0x16   : > { %p2424_p0 = pnand %p2423_p13, %p2422_p12 }
  0x18   : > { %p2425_p3 = pneg %p2424_p0 }
  0x1a   : > { %p2430_p7 = pnand %p2428_p5, %p2425_p3 }
  0x1c   : > { %2433 = shalt.err (!%p2430_p7)
}
  0x1d   : > { %s2434_s11 = scalar_lea.vmem %s2637_s25, 768  ;;  %p2442_p2 = scmp.lt.s32.totalorder %s2637_s25, %s2637_s25 }
  0x1e   : > { %p2435_p9 = scmp.ne.s32.totalorder %s2637_s25, %s2434_s11  ;;  %p2443_p6 = scmp.lt.s32.totalorder %s2434_s11, %s2434_s11 }
  0x20   : > { %p2437_p10 = pnand %p2435_p9, %p2423_p13  ;;  %p2444_p4 = por %p2443_p6, %p2442_p2 }
  0x22   : > { %p2438_p1 = pneg %p2437_p10 }
  0x24   : > { %p2445_p8 = pnand %p2444_p4, %p2438_p1 }
  0x26   : > { %2448 = shalt.err (!%p2445_p8)
}
  0x27   : > { %s2552_s12 = smov 128   ;;  %s2553_s13 = smov 8  }
  0x28   : > { %2277 = dma.hbm_to_vmem [thread:$0]  (!%p2644_p11), %s3734_s1, 768, %s2637_s25, [#allocation8], %s2552_s12, %s2552_s12, %s2553_s13  }
  0x29   : > { %p26_p2 = scmp.eq.s32.totalorder %s25_s29, 0  ;;  %p35_p1 = scmp.ne.s32.totalorder %s2545_s17, %s2541_s16 }
  0x2a   : > { %p36_p4 = scmp.eq.s32.totalorder %s2549_s18, 0  ;;  %p2287_p6 = scmp.lt.s32.totalorder %s2549_s18, 2 }
  0x2b   : > { %s2680_s24 = scalar_select %p26_p2, %s2545_s17, %s28_s28  }
  0x2c   : > { %p37_p8 = por %p36_p4, %p35_p1  ;;  %p3791_p10 = scmp.eq.s32.totalorder %s2614_s19, 1 }
  0x2d   : > { %s173_s5 = sand.u32 1, %s2545_s17   ;;  %s1933_s6 = sshll.u32 %s2549_s18, 7 }
  0x2e   : > { %p2684_p12 = por %p3791_p10, %p35_p1  ;;  %s1724_s7 = sshll.u32 %s173_s5, 3 }
  0x2f   : > { %s2693_s9 = scalar_lea.hbm %s3733_s0, %s1933_s6  ;;  %s177_s25 = scalar_lea.vmem [#allocation4], %s1724_s7 }
  0x30   : > { %s185_s28 = sshll.u32 %s177_s25, 4  ;;  %p2695_p11 = pnand %p2287_p6, %p37_p8  ;;  %s2699_s28 = int_to_ptr.vmem [resolvable:$true] %s185_s28 }
  0x31   : > { %s174_s10 = scalar_lea.sflag [#allocation5], %s173_s5  ;;  %s2449_s11 = scalar_lea.hbm %s2693_s9, 128 }
  0x32   : > { %p2450_p13 = scmp.ne.s32.totalorder %s2693_s9, %s2449_s11  ;;  %p2451_p0 = pneg %p2695_p11 }
  0x33   : > { %s2454_s14 = scalar_lea.hbm %s3733_s0, 256  ;;  %p2455_p7 = scmp.lt.u32.totalorder %s2693_s9, %s3733_s0 }
  0x34   : > { %p2452_p3 = pnand %p2451_p0, %p2450_p13  ;;  %p2456_p9 = scmp.lt.u32.totalorder %s2454_s14, %s2449_s11 }
  0x35   : > { %p2458_p1 = scmp.lt.u32.totalorder %s2449_s11, %s2693_s9 }
  0x36   : > { %p2453_p5 = pneg %p2452_p3  ;;  %p2457_p2 = por %p2456_p9, %p2455_p7 }
  0x38   : > { %p2459_p4 = por %p2458_p1, %p2457_p2 }
  0x3a   : > { %p2460_p6 = pnand %p2459_p4, %p2453_p5 }
  0x3c   : > { %2463 = shalt.err (!%p2460_p6)
}
  0x3d   : > { %s2464_s5 = scalar_lea.vmem %s2699_s28, 128  ;;  %s2554_s7 = smov [#allocation4]  }
  0x3e   : > { %p2465_p8 = scmp.ne.s32.totalorder %s2699_s28, %s2464_s5  ;;  %s2469_s26 = sshll.u32 %s2554_s7, 4  ;;  %s2470_s26 = int_to_ptr.vmem [resolvable:$false] %s2469_s26 }
  0x3f   : > { %s2471_s8 = scalar_lea.vmem %s2470_s26, 256  ;;  %p2472_p3 = scmp.lt.s32.totalorder %s2699_s28, %s2470_s26 }
  0x40   : > { %p2467_p10 = pnand %p2465_p8, %p2451_p0  ;;  %p2473_p7 = scmp.lt.s32.totalorder %s2471_s8, %s2464_s5 }
  0x42   : > { %p2468_p13 = pneg %p2467_p10  ;;  %p2474_p9 = por %p2473_p7, %p2472_p3 }
  0x44   : > { %p2475_p2 = pnand %p2474_p9, %p2468_p13 }
  0x46   : > { %2478 = shalt.err (!%p2475_p2)
}
  0x47   : > { %2281 = dma.hbm_to_vmem [thread:$0]  (!%p2695_p11), %s2693_s9, 128, %s2699_s28, %s174_s10  }
  0x48   : > { %p3794_p5 = scmp.ne.s32.totalorder %s3789_s23, 0 }
  0x49   : > { %s2729_s25 = sand.u32 (!%p3794_p5), 1, %s2541_s16   ;;  %p3795_p0 = scmp.ne.s32.totalorder (!%p3794_p5), %s3787_s21, 0 }
  0x4a   : > { %194 = sbr.rel (%p3794_p5) target bundleno = 1750 (0x6d6), region = 36  ;;  %s1728_s11 = sshll.u32 (!%p3794_p5), %s2729_s25, 3 }
  0x4b   : > { %s197_s12 = scalar_lea.sflag (!%p3794_p5), [#allocation5], %s2729_s25  ;;  %s200_s13 = scalar_lea.vmem (!%p3794_p5), [#allocation4], %s1728_s11 }
  0x51   : > { %2524 = dma.done.wait (%p3795_p0), %s197_s12, 128  }
  0x52   : > { %2526 = vsyncadd (%p3795_p0), %s197_s12, 4294967168  ;;  %p3796_p1 = scmp.eq.s32.totalorder %s2614_s19, 0 }
  0x54   : > { %2528 = dma.done.wait (%p3796_p1), [#allocation8], 768   ;;  %p3797_p11 = pmov %p3796_p1 }
  0x55   : > { %v262_v0 = vlaneseq  ;;  %v2555_v1 = vmov 0.0   ;;  %s2556_s23 = smov 2   ;;  %v2557_v2 = vmov 1.0   ;;  %s2558_s21 = smov 1   ;;  %v2753_v4 = vld [vmem:[%s200_s13] sm:$0xff]  ;;  %v2561_v17 = vmov 0  }
  0x56   : > { %2530 = vsyncadd (%p3797_p11), [#allocation8], 4294966528  ;;  %297 = vrot.lane.b32.xlu1 %v2555_v1, %s2556_s23  ;;  %230 = vst [vmem:[#allocation2] sm:$0xff] %v2555_v1  ;;  %485 = vmatprep.mubr.f32.mxu0 %v2555_v1  ;;  %v2758_v5 = vld [vmem:[%s3736_s3] sm:$0x1]  ;;  %v2763_v6 = vcombine.high %v2753_v4, %v2753_v4  ;;  %s2559_s29 = smov 127  }
  0x57   : > { %231 = vst [vmem:[#allocation2 + $0x8] sm:$0xff] %v2555_v1  ;;  %251 = vst [vmem:[#allocation3 + $0x8] sm:$0xff] %v2555_v1  ;;  %vm264_vm0 = vcmp.lt.s32.totalorder %v262_v0, 256  ;;  %711 = vmatprep.mubr.f32.mxu1 %v2555_v1  ;;  %v2751_v3 = vshrl.u32 %v262_v0, 7  ;;  %v1239_v8 = vadd.s32 1, %v2758_v5  ;;  %s2560_s10 = smov 126  }
  0x58   : > { %252 = vst [vmem:[#allocation3 + $0x10] sm:$0xff] %v2555_v1  ;;  %266 = vst.msk [vmem:[#allocation2] ss:$8 sm:$0x3] %vm264_vm0, %v2557_v2  ;;  %v268_v15 = vld [vmem:[%s3735_s2] sm:$0x3] }
  0x59   : > { %274 = vst [vmem:[#allocation3 + $0x8] sm:$0xf] %v2753_v4  ;;  %v2768_v7 = vsub.s32 0, %v2751_v3  ;;  %275 = vst [vmem:[#allocation3 + $0x10] sm:$0xf] %v2763_v6  ;;  %vm280_vm1 = vcmp.ge.s32.totalorder %v268_v15, 2 }
  0x5a   : > { %325 = vrot.lane.b32.xlu1 %v2555_v1, %s2558_s21  ;;  %vm281_vm2 = vcmp.lt.s32.totalorder %v268_v15, 16  ;;  %vm312_vm4 = vcmp.ge.s32.totalorder %v268_v15, 1  ;;  %v290_v19 = vsub.s32 1, %v2751_v3  ;;  %vm3742_vm6 = vcmask 15360   ;;  %v788_v53 = vld [vmem:[#allocation7 + $0x18] sm:$0xff]  ;;  %v789_v56 = vld [vmem:[#allocation7 + $0x20] sm:$0xff] }
  0x5b   : > { %v2773_v9 = vrot.slane %v1239_v8, %v2768_v7  ;;  %vm282_vm3 = vmand %vm280_vm1, %vm281_vm2  ;;  %vm342_vm7 = vcmp.ge.s32.totalorder %v268_v15, 0  ;;  %vm343_vm8 = vcmp.lt.s32.totalorder %v268_v15, 15  ;;  %vm372_vm10 = vcmp.lt.s32.totalorder %v268_v15, 14  ;;  %v401_v15 = vld [vmem:[#allocation7 + $0x8] sm:$0xff]  ;;  %s1730_s6 = sshll.u32 %s2729_s25, 4  ;;  %s1930_s26 = sshll.u32 %s2614_s19, 7 }
  0x5c   : > { %v283_v18 = vsel %vm282_vm3, 1, %v2561_v17  ;;  %vm313_vm5 = vmand %vm312_vm4, %vm281_vm2  ;;  %vm3746_vm12 = vcmask 7168   ;;  %v3802_v35 = vmov 0  ;;  %v3804_v37 = vmov 0  ;;  %s228_s5 = scalar_lea.vmem [#allocation9], %s1730_s6  ;;  %s3689_s12 = scalar_lea.hbm %s3737_s4, %s1930_s26 }
  0x5d   : > { %v287_v21 = vrot.slane %v283_v18, %v2768_v7  ;;  %v314_v22 = vsel %vm313_vm5, 1, %v2561_v17  ;;  %v291_v23 = vrot.slane %v283_v18, %v290_v19  ;;  %vm344_vm13 = vmand %vm342_vm7, %vm343_vm8  ;;  %vm2562_vm1 = vmmov 1   ;;  %s1637_s7 = sshll.u32 %s228_s5, 4  ;;  %s1625_s13 = scalar_lea.sflag [#allocation6], %s2729_s25  ;;  %s3684_s7 = int_to_ptr.vmem [resolvable:$true] %s1637_s7 }
  0x5e   : > { %361 = vrot.lane.b32.xlu1 %v2555_v1, %s2559_s29  ;;  %v318_v26 = vrot.slane %v314_v22, %v2768_v7  ;;  %v322_v28 = vrot.slane %v314_v22, %v290_v19  ;;  %vm373_vm14 = vmand %vm342_vm7, %vm372_vm10  ;;  %v345_v38 = vsel %vm344_vm13, 1, %v2561_v17  ;;  %vm3750_vm4 = vcmask 1039360   ;;  %s2564_s19 = smov [#allocation9]  }
  0x5f   : > { %vm2820_vm9 = vcmp.eq.s32.totalorder %v287_v21, 1  ;;  %vm2826_vm11 = vcmp.eq.s32.totalorder %v291_v23, 1  ;;  %v2830_v32 = vld [vmem:[#allocation2 + $0x8] sm:$0xff]  ;;  %v2833_v34 = vld [vmem:[#allocation2] sm:$0xff]  ;;  %v374_v40 = vsel %vm373_vm14, 1, %v2561_v17  ;;  %v353_v44 = vrot.slane %v345_v38, %v290_v19 }
  0x60   : > { %v2775_v10 = vld [vmem:[#allocation3 + $0x8] sm:$0xff]  ;;  %v2782_v11 = vld [vmem:[#allocation3 + $0x10] sm:$0xff]  ;;  %vm2835_vm15 = vcmp.eq.s32.totalorder %v318_v26, 1  ;;  %vm2840_vm0 = vcmp.eq.s32.totalorder %v322_v28, 1  ;;  %vm2848_vm2 = vmpackc.low %vm2826_vm11, %vm2562_vm1  ;;  %v382_v48 = vrot.slane %v374_v40, %v290_v19  ;;  %v3812_v52 = vmov 0 }
  0x61   : > { %299 = vrot.lane.b32.xlu0 %v2775_v10, %s2556_s23  ;;  %502 = vst [vmem:[#allocation3 + $0x8] sm:$0xf] %v2753_v4  ;;  %503 = vst [vmem:[#allocation3 + $0x10] sm:$0xf] %v2763_v6  ;;  %v3803_v35 = vsel %vm2835_vm15, 4294967295, %v3802_v35  ;;  %v3805_v37 = vsel %vm2840_vm0, 4294967295, %v3804_v37  ;;  %v378_v57 = vrot.slane %v374_v40, %v2768_v7  ;;  %v349_v58 = vrot.slane %v345_v38, %v2768_v7 }
  0x62   : > { %327 = vrot.lane.b32.xlu1 %v2775_v10, %s2558_s21  ;;  %vm2858_vm3 = vmpackc.low %vm2820_vm9, %vm2562_vm1  ;;  %vm2875_vm7 = vcmp.eq.s32.totalorder %v353_v44, 1  ;;  %vm3741_vm8 = vcmask 1031168   ;;  %vm2890_vm10 = vcmp.eq.s32.totalorder %v382_v48, 1  ;;  %v3820_v0 = vmov 0 }
  0x63   : > { %vm2868_vm5 = vmpackc.low %vm2562_vm1, %vm2840_vm0  ;;  %v3813_v52 = vsel %vm2875_vm7, 4294967295, %v3812_v52  ;;  %vm2897_vm11 = vcmp.eq.s32.totalorder %v378_v57, 1  ;;  %vm2902_vm13 = vcmp.eq.s32.totalorder %v349_v58, 1  ;;  %v3141_v23 = vrot.slane %v2758_v5, %v2768_v7 }
  0x64   : > { %vm2882_vm9 = vmpackc.low %vm2562_vm1, %vm2835_vm15  ;;  %v3821_v0 = vsel %vm2902_vm13, 4294967295, %v3820_v0  ;;  %v1125_v5 = vadd.s32 144, %v2751_v3  ;;  %v1126_v7 = vadd.s32 152, %v2751_v3 }
  0x65   : > { %301 = vrot.lane.b32.xlu0 %v2782_v11, %s2556_s23  ;;  %vm3745_vm14 = vmpackc.low %vm2890_vm10, %vm2875_vm7 }
  0x66   : > { %389 = vrot.lane.b32.xlu1 %v2555_v1, %s2560_s10 }
  0x68   : > { %v2797_v12 = vld [vmem:[#allocation3 + $0x10] sm:$0xff]  ;;  %v2803_v13 = vld [vmem:[#allocation3 + $0x8] sm:$0xff] }
  0x69   : > { %329 = vrot.lane.b32.xlu0 %v2782_v11, %s2558_s21 }
  0x6a   : > { %385 = vrot.lane.b32.xlu1 %v2775_v10, %s2560_s10 }
  0x6d   : > { %359 = vrot.lane.b32.xlu0 %v2782_v11, %s2559_s29 }
  0x6e   : > { %533 = vrot.lane.b32.xlu1 %v2797_v12, %s2558_s21 }
  0x71   : > { %387 = vrot.lane.b32.xlu0 %v2782_v11, %s2560_s10 }
  0x72   : > { %535 = vrot.lane.b32.xlu1 %v2555_v1, %s2558_s21 }
  0x75   : > { %357 = vrot.lane.b32.xlu0 %v2775_v10, %s2559_s29 }
  0x76   : > { %582 = vrot.lane.b32.xlu1 %v2797_v12, %s2559_s29 }
  0x79   : > { %531 = vrot.lane.b32.xlu0 %v2803_v13, %s2558_s21 }
  0x7d   : > { %529 = vrot.lane.b32.xlu0 %v2555_v1, %s2558_s21 }
  0x81   : > { %541 = vrot.lane.b32.xlu0 %v2555_v1, %s2558_s21 }
  0xc8   : > { %v298_v14 = vpop.permute.xlu1 %297 }
  0xcc   : > { %v326_v16 = vpop.permute.xlu1 %325 }
  0xd0   : > { %v362_v20 = vpop.permute.xlu1 %361 }
  0xd3   : > { %v300_v24 = vpop.permute.xlu0 %299 }
  0xd4   : > { %v304_v27 = vsel %vm3742_vm6, %v298_v14, %v300_v24  ;;  %v328_v30 = vpop.permute.xlu1 %327  ;;  %v400_v14 = vld [vmem:[#allocation7] sm:$0xff] }
  0xd5   : > { %v332_v36 = vsel %vm3746_vm12, %v326_v16, %v328_v30  ;;  %v2341_v47 = vpack.c.bf16 %v304_v27, %v2833_v34 }
  0xd6   : > { %v2347_v54 = vpack.c.bf16 %v2775_v10, %v332_v36 }
  0xd7   : > { %v302_v31 = vpop.permute.xlu0 %301 }
  0xd8   : > { %v305_v33 = vsel %vm3742_vm6, %v300_v24, %v302_v31  ;;  %v390_v45 = vpop.permute.xlu1 %389  ;;  %vm3744_vm6 = vcmask 392192  }
  0xd9   : > { %v2338_v43 = vpack.c.bf16 %v305_v33, %v2830_v32 }
  0xdb   : > { %v330_v39 = vpop.permute.xlu0 %329  ;;  %2339 = vmatprep.subr.msk.bf16.mxu0 %vm2848_vm2, %v2338_v43 }
  0xdc   : > { %v333_v41 = vsel %vm3746_vm12, %v328_v30, %v330_v39  ;;  %2342 = vmatpush1.bf16.msk.msra.mxu0 %vm2858_vm3, %v2341_v47  ;;  %v386_v60 = vpop.permute.xlu1 %385 }
  0xdd   : > { %v2344_v51 = vpack.c.bf16 %v2782_v11, %v333_v41 }
  0xdf   : > { %v360_v49 = vpop.permute.xlu0 %359  ;;  %2345 = vmatprep.subr.msk.bf16.mxu0 %vm2868_vm5, %v2344_v51 }
  0xe0   : > { %2348 = vmatpush1.bf16.msk.msra.mxu0 %vm2882_vm9, %v2347_v54  ;;  %v365_v55 = vsel %vm3750_vm4, %v360_v49, %v362_v20  ;;  %v534_v17 = vpop.permute.xlu1 %533 }
  0xe3   : > { %v388_v59 = vpop.permute.xlu0 %387 }
  0xe4   : > { %v393_v61 = vsel %vm3741_vm8, %v388_v59, %v390_v45  ;;  %v392_v63 = vsel %vm3741_vm8, %v386_v60, %v388_v59  ;;  %vm3743_vm8 = vmpackc.low %vm2897_vm11, %vm2902_vm13  ;;  %v536_v36 = vpop.permute.xlu1 %535 }
  0xe5   : > { %v2350_v10 = vpack.c.bf16 %v393_v61, %v365_v55 }
  0xe7   : > { %v358_v2 = vpop.permute.xlu0 %357  ;;  %2351 = vmatprep.subr.msk.bf16.mxu0 %vm3745_vm14, %v2350_v10  ;;  %vm3747_vm14 = vmpackc.low %vm2840_vm0, %vm2840_vm0  ;;  %v3826_v10 = vmov 0 }
  0xe8   : > { %v364_v8 = vsel %vm3750_vm4, %v358_v2, %v360_v49  ;;  %v583_v38 = vpop.permute.xlu1 %582 }
  0xe9   : > { %v2353_v11 = vpack.c.bf16 %v392_v63, %v364_v8 }
  0xeb   : > { %2354 = vmatpush1.bf16.msk.msra.mxu0 %vm3743_vm8, %v2353_v11  ;;  %v532_v16 = vpop.permute.xlu0 %531  ;;  %vm2934_vm8 = vmpackc.low %vm2840_vm0, %vm2562_vm1 }
  0xec   : > { %v548_v19 = vsel %vm3746_vm12, %v532_v16, %v534_v17 }
  0xed   : > { %v2356_v22 = vpack.c.bf16 %v548_v19, %v2830_v32 }
  0xee   : > { %1731 = vmatmul.mubr.msk.f32.vlgmr.msra.gmra.mrb[0].mxu0 %vm3744_vm6, %v400_v14 }
  0xef   : > { %491 = vmatprep.mubr.f32.mxu0 %v2555_v1  ;;  %v530_v18 = vpop.permute.xlu0 %529  ;;  %2357 = vmatprep.subr.msk.bf16.mxu1 %vm2934_vm8, %v2356_v22 }
  0xf0   : > { %v547_v20 = vsel %vm3746_vm12, %v530_v18, %v532_v16 }
  0xf1   : > { %v2359_v24 = vpack.c.bf16 %v547_v20, %v2833_v34 }
  0xf2   : > { %1732 = vmatmul.mubr.msk.f32.gmra.mrb[2].mxu0 %vm3744_vm6, %v401_v15  ;;  %vm2944_vm6 = vmpackc.low %vm2835_vm15, %vm2562_vm1 }
  0xf3   : > { %872 = vmatprep.mubr.f32.mxu0 %v2555_v1  ;;  %2360 = vmatpush1.bf16.msk.msra.mxu1 %vm2944_vm6, %v2359_v24  ;;  %v542_v39 = vpop.permute.xlu0 %541 }
 0x1c1   : > { %v487_v25 = vpop.f32.mrb[0].mxu0 }
 0x1c2   : > { %v498_v26 = vmax.f32 %v487_v25, 0.0  ;;  %v489_v27 = vpop.f32.mrb[1].mxu0  ;;  %v622_v25 = vld [vmem:[#allocation7 + $0x10] sm:$0xff] }
 0x1c3   : > { %v499_v28 = vmax.f32 %v489_v27, 0.0 }
 0x1c4   : > { %537 = vrot.lane.b32.xlu1 %v498_v26, %s2558_s21  ;;  %v2096_v2 = vpack.c.bf16 %v498_v26, %v2803_v13 }
 0x1c5   : > { %v493_v29 = vpop.f32.mrb[2].mxu0  ;;  %539 = vrot.lane.b32.xlu0 %v499_v28, %s2558_s21  ;;  %v2094_v58 = vpack.c.bf16 %v499_v28, %v2797_v12 }
 0x1c6   : > { %v500_v30 = vmax.f32 %v493_v29, 0.0  ;;  %v495_v31 = vpop.f32.mrb[3].mxu0 }
 0x1c7   : > { %v501_v33 = vmax.f32 %v495_v31, 0.0 }
 0x1c8   : > { %543 = vrot.lane.b32.xlu1 %v500_v30, %s2558_s21 }
 0x1c9   : > { %545 = vrot.lane.b32.xlu0 %v501_v33, %s2558_s21 }
 0x1cc   : > { %580 = vrot.lane.b32.xlu1 %v2803_v13, %s2559_s29  ;;  %v3828_v13 = vmov 0 }
 0x1cd   : > { %584 = vrot.lane.b32.xlu0 %v2555_v1, %s2559_s29 }
 0x1d0   : > { %590 = vrot.lane.b32.xlu1 %v2555_v1, %s2559_s29 }
 0x1d1   : > { %588 = vrot.lane.b32.xlu0 %v499_v28, %s2559_s29 }
 0x1d4   : > { %596 = vrot.lane.b32.xlu1 %v2555_v1, %s2559_s29 }
 0x1d5   : > { %594 = vrot.lane.b32.xlu0 %v501_v33, %s2559_s29 }
 0x1d8   : > { %592 = vrot.lane.b32.xlu1 %v500_v30, %s2559_s29 }
 0x1d9   : > { %586 = vrot.lane.b32.xlu0 %v498_v26, %s2559_s29 }
 0x1dc   : > { %743 = vrot.lane.b32.xlu1 %v2555_v1, %s2558_s21 }
 0x1dd   : > { %729 = vrot.lane.b32.xlu0 %v2555_v1, %s2556_s23 }
 0x236   : > { %v538_v40 = vpop.permute.xlu1 %537 }
 0x237   : > { %v540_v41 = vpop.permute.xlu0 %539  ;;  %v549_v45 = vsel %vm3746_vm12, %v536_v36, %v538_v40 }
 0x238   : > { %v550_v43 = vsel %vm3746_vm12, %v538_v40, %v540_v41 }
 0x23a   : > { %v544_v44 = vpop.permute.xlu1 %543 }
 0x23b   : > { %v551_v47 = vsel %vm3746_vm12, %v542_v39, %v544_v44  ;;  %v546_v48 = vpop.permute.xlu0 %545 }
 0x23c   : > { %v552_v49 = vsel %vm3746_vm12, %v544_v44, %v546_v48  ;;  %vm3748_vm12 = vmpackc.low %vm2835_vm15, %vm2835_vm15  ;;  %v2365_v60 = vpack.c.bf16 %v551_v47, %v549_v45 }
 0x23d   : > { %v2362_v57 = vpack.c.bf16 %v552_v49, %v550_v43 }
 0x23e   : > { %v581_v51 = vpop.permute.xlu1 %580 }
 0x23f   : > { %v585_v54 = vpop.permute.xlu0 %584  ;;  %2363 = vmatprep.subr.msk.bf16.mxu1 %vm3747_vm14, %v2362_v57  ;;  %v598_v59 = vsel %vm3750_vm4, %v581_v51, %v583_v38  ;;  %vm2999_vm14 = vmpackc.low %vm2875_vm7, %vm2562_vm1 }
 0x240   : > { %v599_v55 = vsel %vm3750_vm4, %v583_v38, %v585_v54  ;;  %2366 = vmatpush1.bf16.msk.msra.mxu1 %vm3748_vm12, %v2365_v60  ;;  %v3827_v10 = vsel %vm2999_vm14, 4294967295, %v3826_v10  ;;  %vm3009_vm12 = vmpackc.low %vm2902_vm13, %vm2562_vm1  ;;  %v2371_v16 = vpack.c.bf16 %v598_v59, %v500_v30 }
 0x241   : > { %2095 = vmatprep.subr.bf16.mxu1 %v2094_v58  ;;  %v2368_v11 = vpack.c.bf16 %v599_v55, %v501_v33  ;;  %v3829_v13 = vsel %vm3009_vm12, 4294967295, %v3828_v13  ;;  %vm3752_vm1 = vmpackc.low %vm2902_vm13, %vm2902_vm13 }
 0x242   : > { %v591_v61 = vpop.permute.xlu1 %590 }
 0x243   : > { %v589_v63 = vpop.permute.xlu0 %588 }
 0x244   : > { %2097 = vmatpush1.bf16.msra.mxu1 %v2096_v2  ;;  %v601_v12 = vsel %vm3750_vm4, %v589_v63, %v591_v61 }
 0x245   : > { %2369 = vmatprep.subr.msk.bf16.mxu1 %vm2999_vm14, %v2368_v11  ;;  %vm3753_vm14 = vmpackc.low %vm2875_vm7, %vm2875_vm7 }
 0x246   : > { %v597_v8 = vpop.permute.xlu1 %596 }
 0x247   : > { %v595_v14 = vpop.permute.xlu0 %594 }
 0x248   : > { %v603_v15 = vsel %vm3750_vm4, %v595_v14, %v597_v8  ;;  %2372 = vmatpush1.bf16.msk.msra.mxu1 %vm3009_vm12, %v2371_v16 }
 0x249   : > { %v2374_v22 = vpack.c.bf16 %v603_v15, %v601_v12 }
 0x24a   : > { %v593_v17 = vpop.permute.xlu1 %592 }
 0x24b   : > { %v602_v18 = vsel %vm3750_vm4, %v593_v17, %v595_v14  ;;  %v587_v19 = vpop.permute.xlu0 %586  ;;  %2375 = vmatprep.subr.msk.bf16.mxu1 %vm3753_vm14, %v2374_v22 }
 0x24c   : > { %v600_v20 = vsel %vm3750_vm4, %v587_v19, %v589_v63  ;;  %vm3751_vm4 = vcmask 654336  }
 0x24d   : > { %v2377_v24 = vpack.c.bf16 %v602_v18, %v600_v20 }
 0x24e   : > { %v744_v30 = vpop.permute.xlu1 %743 }
 0x24f   : > { %2378 = vmatpush1.bf16.msk.msra.mxu1 %vm3752_vm1, %v2377_v24  ;;  %v730_v31 = vpop.permute.xlu0 %729  ;;  %vm3831_vm1 = vcmask 7168  }
 0x250   : > { %vm3833_vm12 = vmmov %vm3831_vm1 }
 0x252   : > { %1733 = vmatmul.mubr.msk.f32.vlgmr.msra.gmra.mrb[0].mxu1 %vm3751_vm4, %v622_v25  ;;  %vm3830_vm4 = vcmask 15360   ;;  %v1123_v25 = vadd.s32 128, %v2751_v3 }
 0x253   : > { %1097 = vmatprep.mubr.f32.mxu1 %v2555_v1  ;;  %vm3832_vm14 = vmmov %vm3830_vm4 }
 0x325   : > { %v713_v26 = vpop.f32.mrb[0].mxu1 }
 0x326   : > { %v3035_v27 = vmax.f32 %v713_v26, 0.0  ;;  %v715_v28 = vpop.f32.mrb[1].mxu1  ;;  %v1124_v26 = vadd.s32 136, %v2751_v3 }
 0x327   : > { %v3037_v29 = vmax.f32 %v715_v28, 0.0  ;;  %v1108_v28 = vadd.s32 8, %v2751_v3 }
 0x328   : > { %889 = vst [vmem:[#allocation3 + $0x8] sm:$0xff] %v3035_v27  ;;  %745 = vrot.lane.b32.xlu1 %v3035_v27, %s2558_s21  ;;  %731 = vrot.lane.b32.xlu0 %v3035_v27, %s2556_s23 }
 0x329   : > { %890 = vst [vmem:[#allocation3 + $0x10] sm:$0xff] %v3037_v29 }
 0x32c   : > { %747 = vrot.lane.b32.xlu0 %v3037_v29, %s2558_s21  ;;  %733 = vrot.lane.b32.xlu1 %v3037_v29, %s2556_s23  ;;  %s2479_s23 = scalar_lea.vmem %s3684_s7, 256 }
 0x32d   : > { %p2480_p4 = scmp.ne.s32.totalorder %s3684_s7, %s2479_s23 }
 0x32f   : > { %p2481_p6 = pnand %p2480_p4, %p2684_p12 }
 0x330   : > { %762 = vrot.lane.b32.xlu0 %v3037_v29, %s2559_s29  ;;  %764 = vrot.lane.b32.xlu1 %v2555_v1, %s2559_s29 }
 0x331   : > { %p2482_p8 = pneg %p2481_p6 }
 0x334   : > { %776 = vrot.lane.b32.xlu0 %v3037_v29, %s2560_s10  ;;  %778 = vrot.lane.b32.xlu1 %v2555_v1, %s2560_s10 }
 0x338   : > { %760 = vrot.lane.b32.xlu0 %v3035_v27, %s2559_s29  ;;  %774 = vrot.lane.b32.xlu1 %v3035_v27, %s2560_s10 }
 0x33c   : > { %916 = vrot.lane.b32.xlu0 %v2555_v1, %s2558_s21  ;;  %922 = vrot.lane.b32.xlu1 %v2555_v1, %s2558_s21 }
 0x340   : > { %928 = vrot.lane.b32.xlu0 %v2555_v1, %s2558_s21  ;;  %920 = vrot.lane.b32.xlu1 %v3037_v29, %s2558_s21 }
 0x344   : > { %918 = vrot.lane.b32.xlu0 %v3035_v27, %s2558_s21  ;;  %969 = vrot.lane.b32.xlu1 %v3037_v29, %s2559_s29 }
 0x39a   : > { %v746_v33 = vpop.permute.xlu1 %745  ;;  %v732_v36 = vpop.permute.xlu0 %731 }
 0x39b   : > { %v735_v38 = vsel %vm3830_vm4, %v730_v31, %v732_v36  ;;  %v749_v44 = vsel %vm3833_vm12, %v744_v30, %v746_v33  ;;  %vm3834_vm4 = vcmask 1039360   ;;  %vm3835_vm12 = vcmask 1031168  }
 0x39c   : > { %v2383_v49 = vpack.c.bf16 %v735_v38, %v2833_v34  ;;  %v2389_v59 = vpack.c.bf16 %v3035_v27, %v749_v44  ;;  %v2563_v30 = vmov 1.0|1.0   ;;  %v3845_v31 = vmov 0 }
 0x39e   : > { %v748_v39 = vpop.permute.xlu0 %747  ;;  %v734_v40 = vpop.permute.xlu1 %733 }
 0x39f   : > { %v750_v41 = vsel %vm3831_vm1, %v746_v33, %v748_v39  ;;  %v736_v43 = vsel %vm3832_vm14, %v732_v36, %v734_v40  ;;  %vm3840_vm14 = vcmask 392192   ;;  %v1109_v33 = vadd.s32 16, %v2751_v3 }
 0x3a0   : > { %v2380_v48 = vpack.c.bf16 %v736_v43, %v2830_v32  ;;  %v2386_v54 = vpack.c.bf16 %v3037_v29, %v750_v41  ;;  %v1110_v36 = vadd.s32 24, %v2751_v3  ;;  %v1127_v39 = vadd.s32 160, %v2751_v3 }
 0x3a1   : > { %v1128_v40 = vadd.s32 168, %v2751_v3  ;;  %v3849_v41 = vmov 0  ;;  %v1111_v43 = vadd.s32 32, %v2751_v3 }
 0x3a2   : > { %v763_v45 = vpop.permute.xlu0 %762  ;;  %v765_v47 = vpop.permute.xlu1 %764  ;;  %2381 = vmatprep.subr.msk.bf16.mxu0 %vm2848_vm2, %v2380_v48  ;;  %vm3836_vm2 = vmmov %vm3834_vm4  ;;  %v3858_v48 = vmov 0 }
 0x3a3   : > { %2384 = vmatpush1.bf16.msk.msra.mxu0 %vm2858_vm3, %v2383_v49  ;;  %v767_v51 = vsel %vm3834_vm4, %v763_v45, %v765_v47  ;;  %vm3837_vm3 = vmmov %vm3835_vm12  ;;  %v1112_v47 = vadd.s32 40, %v2751_v3  ;;  %v1129_v49 = vadd.s32 176, %v2751_v3 }
 0x3a4   : > { %2387 = vmatprep.subr.msk.bf16.mxu0 %vm2868_vm5, %v2386_v54  ;;  %vm3838_vm5 = vmpackc.low %vm2890_vm10, %vm2875_vm7  ;;  %v3861_v54 = vmov 0 }
 0x3a5   : > { %vm3841_vm10 = vmmov %vm3840_vm14 }
 0x3a6   : > { %v777_v55 = vpop.permute.xlu0 %776  ;;  %v779_v57 = vpop.permute.xlu1 %778  ;;  %vm3842_vm4 = vmmov %vm3831_vm1 }
 0x3a7   : > { %v781_v58 = vsel %vm3835_vm12, %v777_v55, %v779_v57  ;;  %2390 = vmatpush1.bf16.msk.msra.mxu0 %vm2882_vm9, %v2389_v59  ;;  %vm3839_vm9 = vmpackc.low %vm2897_vm11, %vm2902_vm13  ;;  %vm1159_vm11 = vcmp.eq.s32.totalorder %v1123_v25, %v3141_v23  ;;  %vm1160_vm12 = vcmp.eq.s32.totalorder %v1124_v26, %v3141_v23  ;;  %v1114_v57 = vadd.s32 56, %v2751_v3 }
 0x3a8   : > { %v2392_v63 = vpack.c.bf16 %v781_v58, %v767_v51  ;;  %v1130_v51 = vadd.s32 184, %v2751_v3  ;;  %v3864_v58 = vmov 0  ;;  %v3868_v59 = vmov 0 }
 0x3aa   : > { %v761_v42 = vpop.permute.xlu0 %760  ;;  %v775_v60 = vpop.permute.xlu1 %774  ;;  %2393 = vmatprep.subr.msk.bf16.mxu0 %vm3838_vm5, %v2392_v63  ;;  %vm3164_vm5 = vmpackc.low %vm1160_vm12, %vm1159_vm11  ;;  %vm3851_vm12 = vcmp.eq.s32.totalorder %v1126_v7, %v3141_v23  ;;  %v1115_v63 = vadd.s32 64, %v2751_v3 }
 0x3ab   : > { %v766_v46 = vsel %vm3836_vm2, %v761_v42, %v763_v45  ;;  %v780_v61 = vsel %vm3837_vm3, %v775_v60, %v777_v55  ;;  %vm1260_vm2 = vcmp.eq.s32.totalorder %v1123_v25, %v2773_v9  ;;  %vm1261_vm3 = vcmp.eq.s32.totalorder %v1124_v26, %v2773_v9 }
 0x3ac   : > { %v2395_v2 = vpack.c.bf16 %v780_v61, %v766_v46  ;;  %v3856_v45 = vmov 0  ;;  %v1113_v55 = vadd.s32 48, %v2751_v3  ;;  %v3871_v42 = vmov 0 }
 0x3ad   : > { %v1131_v60 = vadd.s32 192, %v2751_v3  ;;  %v1132_v46 = vadd.s32 200, %v2751_v3  ;;  %v3875_v61 = vmov 0  ;;  %v3899_v25 = vmov 0 }
 0x3ae   : > { %v917_v50 = vpop.permute.xlu0 %916  ;;  %2396 = vmatpush1.bf16.msk.msra.mxu0 %vm3839_vm9, %v2395_v2  ;;  %v3103_v12 = vpop.permute.xlu1 %922  ;;  %vm1144_vm9 = vcmp.eq.s32.totalorder %v1108_v28, %v3141_v23  ;;  %v3877_v2 = vmov 0  ;;  %v1119_v26 = vadd.s32 96, %v2751_v3 }
 0x3af   : > { %2139 = vmatprep.subr.msk.bf16.mxu0 %vm3164_vm5, %v2563_v30 }
 0x3b1   : > { %1734 = vmatmul.mubr.msk.f32.vlgmr.msra.gmra.mrb[4].mxu0 %vm3840_vm14, %v788_v53  ;;  %vm1245_vm14 = vcmp.eq.s32.totalorder %v1108_v28, %v2773_v9  ;;  %v3881_v53 = vmov 0  ;;  %v1120_v28 = vadd.s32 104, %v2751_v3 }
 0x3b2   : > { %v3105_v8 = vpop.permute.xlu0 %928  ;;  %878 = vmatprep.mubr.f32.mxu0 %v2555_v1  ;;  %v921_v11 = vpop.permute.xlu1 %920 }
 0x3b5   : > { %1735 = vmatmul.mubr.msk.f32.gmra.mrb[6].mxu0 %vm3841_vm10, %v789_v56  ;;  %vm1161_vm10 = vcmp.eq.s32.totalorder %v1125_v5, %v3141_v23  ;;  %v3883_v56 = vmov 0 }
 0x3b6   : > { %v919_v14 = vpop.permute.xlu0 %918  ;;  %1404 = vmatprep.mubr.f32.mxu0 %v2763_v6  ;;  %vm3216_vm11 = vmpackc.low %vm3851_vm12, %vm1161_vm10  ;;  %vm1164_vm10 = vcmp.eq.s32.totalorder %v1128_v40, %v3141_v23 }
 0x3b7   : > { %v934_v62 = vsel %vm3831_vm1, %v917_v50, %v919_v14  ;;  %v935_v15 = vsel %vm3842_vm4, %v919_v14, %v921_v11  ;;  %vm3175_vm4 = vmpackc.low %vm1261_vm3, %vm1260_vm2  ;;  %vm1145_vm2 = vcmp.eq.s32.totalorder %v1109_v33, %v3141_v23  ;;  %vm1146_vm3 = vcmp.eq.s32.totalorder %v1110_v36, %v3141_v23 }
 0x3b8   : > { %v2398_v16 = vpack.c.bf16 %v935_v15, %v2830_v32  ;;  %v2401_v17 = vpack.c.bf16 %v934_v62, %v2833_v34  ;;  %v3846_v31 = vsel %vm3175_vm4, 4294967295, %v3845_v31  ;;  %vm3855_vm4 = vcmp.eq.s32.totalorder %v1126_v7, %v2773_v9 }
 0x3b9   : > { %v1116_v50 = vadd.s32 72, %v2751_v3  ;;  %v1133_v11 = vadd.s32 208, %v2751_v3  ;;  %v1134_v14 = vadd.s32 216, %v2751_v3  ;;  %v3887_v62 = vmov 0 }
 0x3ba   : > { %2399 = vmatprep.subr.msk.bf16.mxu1 %vm2934_vm8, %v2398_v16  ;;  %vm1244_vm8 = vcmp.eq.s32.totalorder %v2751_v3, %v2773_v9  ;;  %v1117_v15 = vadd.s32 80, %v2751_v3  ;;  %v1118_v16 = vadd.s32 88, %v2751_v3  ;;  %v3905_v7 = vmov 0 }
 0x3bb   : > { %2402 = vmatpush1.bf16.msk.msra.mxu1 %vm2944_vm6, %v2401_v17  ;;  %vm1143_vm6 = vcmp.eq.s32.totalorder %v2751_v3, %v3141_v23  ;;  %v3889_v17 = vmov 0 }
 0x3bc   : > { %vm3188_vm1 = vmpackc.low %vm1144_vm9, %vm1143_vm6  ;;  %vm3854_vm9 = vcmp.eq.s32.totalorder %v1125_v5, %v2773_v9  ;;  %v3901_v5 = vmov 0 }
 0x3bd   : > { %2141 = vmatpush3.bf16.msk.msra.mxu0 %vm3188_vm1, %v2563_v30  ;;  %vm3204_vm6 = vmpackc.low %vm1245_vm14, %vm1244_vm8  ;;  %vm1247_vm8 = vcmp.eq.s32.totalorder %v1110_v36, %v2773_v9  ;;  %v1137_v36 = vadd.s32 240, %v2751_v3 }
 0x3be   : > { %v3850_v41 = vsel %vm3204_vm6, 4294967295, %v3849_v41  ;;  %2143 = vmatprep.subr.msk.bf16.mxu0 %vm3216_vm11, %v2563_v30  ;;  %vm3230_vm13 = vmpackc.low %vm3855_vm4, %vm3854_vm9  ;;  %vm3860_vm4 = vcmp.eq.s32.totalorder %v1109_v33, %v2773_v9  ;;  %vm3863_vm6 = vcmp.eq.s32.totalorder %v1127_v39, %v3141_v23  ;;  %v3907_v33 = vmov 0 }
 0x3bf   : > { %v3857_v45 = vsel %vm3230_vm13, 4294967295, %v3856_v45  ;;  %vm3238_vm14 = vmpackc.low %vm1146_vm3, %vm1145_vm2  ;;  %vm1148_vm2 = vcmp.eq.s32.totalorder %v1112_v47, %v3141_v23  ;;  %vm3867_vm3 = vcmp.eq.s32.totalorder %v1128_v40, %v2773_v9  ;;  %vm3870_vm13 = vcmp.eq.s32.totalorder %v1111_v43, %v3141_v23 }
 0x3c0   : > { %v3859_v48 = vsel %vm3238_vm14, 4294967295, %v3858_v48  ;;  %vm3250_vm9 = vmpackc.low %vm1247_vm8, %vm3860_vm4  ;;  %vm3866_vm4 = vcmp.eq.s32.totalorder %v1127_v39, %v2773_v9  ;;  %v1138_v39 = vadd.s32 248, %v2751_v3  ;;  %v3911_v40 = vmov 0 }
 0x3c1   : > { %2145 = vmatpush3.bf16.msk.msra.mxu0 %vm3238_vm14, %v2563_v30  ;;  %v3862_v54 = vsel %vm3250_vm9, 4294967295, %v3861_v54  ;;  %vm3260_vm7 = vmpackc.low %vm1164_vm10, %vm3863_vm6  ;;  %vm1165_vm6 = vcmp.eq.s32.totalorder %v1129_v49, %v3141_v23  ;;  %vm1166_vm10 = vcmp.eq.s32.totalorder %v1130_v51, %v3141_v23 }
 0x3c2   : > { %v3865_v58 = vsel %vm3260_vm7, 4294967295, %v3864_v58  ;;  %2147 = vmatprep.subr.msk.bf16.mxu0 %vm3260_vm7, %v2563_v30  ;;  %vm3273_vm9 = vmpackc.low %vm3867_vm3, %vm3866_vm4  ;;  %vm3873_vm3 = vcmp.eq.s32.totalorder %v1111_v43, %v2773_v9  ;;  %vm3874_vm4 = vcmp.eq.s32.totalorder %v1112_v47, %v2773_v9  ;;  %v1121_v43 = vadd.s32 112, %v2751_v3 }
 0x3c3   : > { %v3869_v59 = vsel %vm3273_vm9, 4294967295, %v3868_v59  ;;  %vm3283_vm15 = vmpackc.low %vm1148_vm2, %vm3870_vm13  ;;  %vm1149_vm13 = vcmp.eq.s32.totalorder %v1113_v55, %v3141_v23  ;;  %vm1150_vm2 = vcmp.eq.s32.totalorder %v1114_v57, %v3141_v23  ;;  %v1122_v47 = vadd.s32 120, %v2751_v3 }
 0x3c4   : > { %v3872_v42 = vsel %vm3283_vm15, 4294967295, %v3871_v42  ;;  %vm3296_vm12 = vmpackc.low %vm3874_vm4, %vm3873_vm3  ;;  %vm3879_vm3 = vcmp.eq.s32.totalorder %v1129_v49, %v2773_v9  ;;  %vm3880_vm4 = vcmp.eq.s32.totalorder %v1130_v51, %v2773_v9  ;;  %v3913_v49 = vmov 0 }
 0x3c5   : > { %2149 = vmatpush3.bf16.msk.msra.mxu0 %vm3283_vm15, %v2563_v30  ;;  %v3876_v61 = vsel %vm3296_vm12, 4294967295, %v3875_v61  ;;  %vm3304_vm8 = vmpackc.low %vm1166_vm10, %vm1165_vm6  ;;  %vm1167_vm6 = vcmp.eq.s32.totalorder %v1131_v60, %v3141_v23  ;;  %vm1168_vm10 = vcmp.eq.s32.totalorder %v1132_v46, %v3141_v23  ;;  %v3917_v51 = vmov 0 }
 0x3c6   : > { %v3878_v2 = vsel %vm3304_vm8, 4294967295, %v3877_v2  ;;  %2151 = vmatprep.subr.msk.bf16.mxu0 %vm3304_vm8, %v2563_v30  ;;  %vm3317_vm12 = vmpackc.low %vm3880_vm4, %vm3879_vm3  ;;  %vm3885_vm3 = vcmp.eq.s32.totalorder %v1113_v55, %v2773_v9  ;;  %vm3886_vm4 = vcmp.eq.s32.totalorder %v1114_v57, %v2773_v9  ;;  %vm1258_vm9 = vcmp.eq.s32.totalorder %v1121_v43, %v2773_v9 }
 0x3c7   : > { %v3882_v53 = vsel %vm3317_vm12, 4294967295, %v3881_v53  ;;  %vm3325_vm15 = vmpackc.low %vm1150_vm2, %vm1149_vm13  ;;  %vm1151_vm13 = vcmp.eq.s32.totalorder %v1115_v63, %v3141_v23  ;;  %vm1152_vm2 = vcmp.eq.s32.totalorder %v1116_v50, %v3141_v23  ;;  %vm1158_vm14 = vcmp.eq.s32.totalorder %v1122_v47, %v3141_v23 }
 0x3c8   : > { %v3884_v56 = vsel %vm3325_vm15, 4294967295, %v3883_v56  ;;  %vm3338_vm12 = vmpackc.low %vm3886_vm4, %vm3885_vm3  ;;  %vm3891_vm3 = vcmp.eq.s32.totalorder %v1131_v60, %v2773_v9  ;;  %vm3892_vm4 = vcmp.eq.s32.totalorder %v1132_v46, %v2773_v9 }
 0x3c9   : > { %2153 = vmatpush3.bf16.msk.msra.mxu0 %vm3325_vm15, %v2563_v30  ;;  %v3888_v62 = vsel %vm3338_vm12, 4294967295, %v3887_v62  ;;  %vm3346_vm0 = vmpackc.low %vm1168_vm10, %vm1167_vm6  ;;  %vm1169_vm6 = vcmp.eq.s32.totalorder %v1133_v11, %v3141_v23  ;;  %vm1170_vm10 = vcmp.eq.s32.totalorder %v1134_v14, %v3141_v23 }
 0x3ca   : > { %v3890_v17 = vsel %vm3346_vm0, 4294967295, %v3889_v17  ;;  %2155 = vmatprep.subr.msk.bf16.mxu0 %vm3346_vm0, %v2563_v30  ;;  %vm3359_vm12 = vmpackc.low %vm3892_vm4, %vm3891_vm3  ;;  %vm3897_vm3 = vcmp.eq.s32.totalorder %v1115_v63, %v2773_v9  ;;  %vm3898_vm4 = vcmp.eq.s32.totalorder %v1116_v50, %v2773_v9 }
 0x3cb   : > { %vm3367_vm8 = vmpackc.low %vm1152_vm2, %vm1151_vm13  ;;  %vm1153_vm13 = vcmp.eq.s32.totalorder %v1117_v15, %v3141_v23  ;;  %vm1154_vm2 = vcmp.eq.s32.totalorder %v1118_v16, %v3141_v23 }
 0x3cc   : > { %vm3388_vm15 = vmpackc.low %vm1170_vm10, %vm1169_vm6 }
 0x3cd   : > { %2157 = vmatpush3.bf16.msk.msra.mxu0 %vm3367_vm8, %v2563_v30  ;;  %v3902_v5 = vsel %vm3388_vm15, 4294967295, %v3901_v5  ;;  %vm3409_vm0 = vmpackc.low %vm1154_vm2, %vm1153_vm13  ;;  %vm1155_vm13 = vcmp.eq.s32.totalorder %v1119_v26, %v3141_v23  ;;  %vm1156_vm2 = vcmp.eq.s32.totalorder %v1120_v28, %v3141_v23 }
 0x3ce   : > { %2159 = vmatprep.subr.msk.bf16.mxu0 %vm3388_vm15, %v2563_v30  ;;  %v3908_v33 = vsel %vm3409_vm0, 4294967295, %v3907_v33  ;;  %vm1259_vm15 = vcmp.eq.s32.totalorder %v1122_v47, %v2773_v9  ;;  %vm3451_vm7 = vmpackc.low %vm1156_vm2, %vm1155_vm13  ;;  %vm3927_vm2 = vcmp.eq.s32.totalorder %v1137_v36, %v2773_v9 }
 0x3d1   : > { %2161 = vmatpush3.bf16.msk.msra.mxu0 %vm3409_vm0, %v2563_v30  ;;  %vm1275_vm0 = vcmp.eq.s32.totalorder %v1138_v39, %v2773_v9 }
 0x484   : > { %v874_v18 = vpop.f32.mrb[4].mxu0 }
 0x485   : > { %v3119_v19 = vmax.f32 %v874_v18, 0.0  ;;  %v876_v20 = vpop.f32.mrb[5].mxu0  ;;  %v3893_v18 = vmov 0 }
 0x486   : > { %v3121_v22 = vmax.f32 %v876_v20, 0.0  ;;  %v3894_v18 = vsel %vm3359_vm12, 4294967295, %v3893_v18  ;;  %v3895_v20 = vmov 0  ;;  %vm3380_vm12 = vmpackc.low %vm3898_vm4, %vm3897_vm3  ;;  %vm3903_vm3 = vcmp.eq.s32.totalorder %v1133_v11, %v2773_v9 }
 0x487   : > { %924 = vrot.lane.b32.xlu1 %v3119_v19, %s2558_s21  ;;  %v3896_v20 = vsel %vm3367_vm8, 4294967295, %v3895_v20  ;;  %v3900_v25 = vsel %vm3380_vm12, 4294967295, %v3899_v25  ;;  %vm3904_vm4 = vcmp.eq.s32.totalorder %v1134_v14, %v2773_v9 }
 0x488   : > { %v880_v24 = vpop.f32.mrb[6].mxu0  ;;  %926 = vrot.lane.b32.xlu0 %v3121_v22, %s2558_s21  ;;  %vm3401_vm12 = vmpackc.low %vm3904_vm4, %vm3903_vm3  ;;  %vm3909_vm3 = vcmp.eq.s32.totalorder %v1117_v15, %v2773_v9  ;;  %vm3910_vm4 = vcmp.eq.s32.totalorder %v1118_v16, %v2773_v9 }
 0x489   : > { %v3127_v32 = vmax.f32 %v880_v24, 0.0  ;;  %v882_v21 = vpop.f32.mrb[7].mxu0  ;;  %v1135_v24 = vadd.s32 224, %v2751_v3  ;;  %v3906_v7 = vsel %vm3401_vm12, 4294967295, %v3905_v7  ;;  %vm3422_vm12 = vmpackc.low %vm3910_vm4, %vm3909_vm3 }
 0x48a   : > { %v3129_v34 = vmax.f32 %v882_v21, 0.0  ;;  %v1136_v21 = vadd.s32 232, %v2751_v3  ;;  %v3912_v40 = vsel %vm3422_vm12, 4294967295, %v3911_v40  ;;  %v3919_v3 = vmov 0 }
 0x48b   : > { %930 = vrot.lane.b32.xlu1 %v3127_v32, %s2558_s21  ;;  %vm1171_vm6 = vcmp.eq.s32.totalorder %v1135_v24, %v3141_v23  ;;  %vm3915_vm3 = vcmp.eq.s32.totalorder %v1135_v24, %v2773_v9  ;;  %v3920_v3 = vsel %vm3451_vm7, 4294967295, %v3919_v3 }
 0x48c   : > { %932 = vrot.lane.b32.xlu0 %v3129_v34, %s2558_s21  ;;  %vm1172_vm10 = vcmp.eq.s32.totalorder %v1136_v21, %v3141_v23  ;;  %vm3916_vm4 = vcmp.eq.s32.totalorder %v1136_v21, %v2773_v9  ;;  %s2483_s21 = sshll.u32 %s2564_s19, 4  ;;  %s2484_s21 = int_to_ptr.vmem [resolvable:$false] %s2483_s21 }
 0x48d   : > { %vm3430_vm8 = vmpackc.low %vm1172_vm10, %vm1171_vm6  ;;  %vm1173_vm6 = vcmp.eq.s32.totalorder %v1137_v36, %v3141_v23  ;;  %vm1174_vm10 = vcmp.eq.s32.totalorder %v1138_v39, %v3141_v23  ;;  %s2485_s9 = scalar_lea.vmem %s2484_s21, 512  ;;  %p2486_p10 = scmp.lt.s32.totalorder %s3684_s7, %s2484_s21 }
 0x48e   : > { %v3914_v49 = vsel %vm3430_vm8, 4294967295, %v3913_v49  ;;  %2163 = vmatprep.subr.msk.bf16.mxu0 %vm3430_vm8, %v2563_v30  ;;  %vm3443_vm12 = vmpackc.low %vm3916_vm4, %vm3915_vm3  ;;  %vm3921_vm3 = vcmp.eq.s32.totalorder %v1119_v26, %v2773_v9  ;;  %vm3922_vm4 = vcmp.eq.s32.totalorder %v1120_v28, %v2773_v9  ;;  %vm1157_vm8 = vcmp.eq.s32.totalorder %v1121_v43, %v3141_v23  ;;  %v970_v9 = vpop.permute.xlu1 %969  ;;  %p2487_p13 = scmp.lt.s32.totalorder %s2485_s9, %s2479_s23 }
 0x48f   : > { %967 = vrot.lane.b32.xlu1 %v3035_v27, %s2559_s29  ;;  %v3918_v51 = vsel %vm3443_vm12, 4294967295, %v3917_v51  ;;  %2165 = vmatpush3.bf16.msk.msra.mxu0 %vm3451_vm7, %v2563_v30  ;;  %vm3462_vm12 = vmpackc.low %vm3922_vm4, %vm3921_vm3  ;;  %vm3943_vm4 = vnez %v3914_v49 }
 0x490   : > { %971 = vrot.lane.b32.xlu0 %v2555_v1, %s2559_s29  ;;  %vm3468_vm13 = vmpackc.low %vm1174_vm10, %vm1173_vm6  ;;  %vm3942_vm10 = vnez %v3908_v33  ;;  %p2488_p3 = por %p2487_p13, %p2486_p10 }
 0x491   : > { %2167 = vmatprep.subr.msk.bf16.mxu0 %vm3468_vm13, %v2563_v30  ;;  %vm3477_vm7 = vmpackc.low %vm1275_vm0, %vm3927_vm2  ;;  %vm3935_vm0 = vnez %v3865_v58  ;;  %vm3944_vm2 = vnez %v3920_v3 }
 0x492   : > { %vm3481_vm3 = vmpackc.low %vm1158_vm14, %vm1157_vm8  ;;  %vm3937_vm14 = vnez %v3878_v2  ;;  %vm3941_vm8 = vnez %v3902_v5  ;;  %p2489_p7 = pnand %p2488_p3, %p2482_p8 }
 0x493   : > { %977 = vrot.lane.b32.xlu1 %v2555_v1, %s2559_s29  ;;  %2169 = vmatpush3.bf16.msk.msra.mxu0 %vm3481_vm3, %v2563_v30  ;;  %vm3488_vm6 = vmpackc.low %vm1259_vm15, %vm1258_vm9  ;;  %vm3934_vm15 = vnez %v3859_v48  ;;  %vm3940_vm9 = vnez %v3896_v20  ;;  %v2128_v20 = vpack.c.bf16 %v3119_v19, %v3035_v27 }
 0x494   : > { %975 = vrot.lane.b32.xlu0 %v3121_v22, %s2559_s29  ;;  %2203 = vmatprep.subr.msk.bf16.mxu0 %vm3164_vm5, %v2563_v30  ;;  %vm3936_vm5 = vnez %v3872_v42 }
 0x496   : > { %1405 = vmatmul.mubr.f32.vlgmr.msra.gmra.mrb[8].mxu0 %v2753_v4 }
 0x497   : > { %983 = vrot.lane.b32.xlu1 %v2555_v1, %s2559_s29  ;;  %2205 = vmatpush3.bf16.msk.msra.mxu0 %vm3188_vm1, %v2563_v30  ;;  %vm3938_vm1 = vnez %v3884_v56 }
 0x498   : > { %981 = vrot.lane.b32.xlu0 %v3129_v34, %s2559_s29  ;;  %2207 = vmatprep.subr.msk.bf16.mxu0 %vm3216_vm11, %v2563_v30  ;;  %vm3939_vm11 = vnez %v3890_v17 }
 0x49b   : > { %979 = vrot.lane.b32.xlu1 %v3127_v32, %s2559_s29  ;;  %2209 = vmatpush3.bf16.msk.msra.mxu0 %vm3934_vm15, %v2563_v30  ;;  %vm3945_vm15 = vcmask 7168  }
 0x49c   : > { %973 = vrot.lane.b32.xlu0 %v3119_v19, %s2559_s29  ;;  %2211 = vmatprep.subr.msk.bf16.mxu0 %vm3935_vm0, %v2563_v30  ;;  %vm3946_vm0 = vmmov %vm3945_vm15 }
 0x49f   : > { %2213 = vmatpush3.bf16.msk.msra.mxu0 %vm3936_vm5, %v2563_v30  ;;  %vm3947_vm5 = vmmov %vm3946_vm0 }
 0x4a0   : > { %2215 = vmatprep.subr.msk.bf16.mxu0 %vm3937_vm14, %v2563_v30  ;;  %vm3948_vm14 = vmmov %vm3946_vm0 }
 0x4a3   : > { %2217 = vmatpush3.bf16.msk.msra.mxu0 %vm3938_vm1, %v2563_v30  ;;  %vm3951_vm1 = vnez %v3805_v37 }
 0x4a4   : > { %2219 = vmatprep.subr.msk.bf16.mxu0 %vm3939_vm11, %v2563_v30  ;;  %vm3952_vm11 = vmpackc.low %vm3951_vm1, %vm3951_vm1 }
 0x4a7   : > { %2221 = vmatpush3.bf16.msk.msra.mxu0 %vm3940_vm9, %v2563_v30  ;;  %vm3953_vm9 = vnez %v3803_v35 }
 0x4a8   : > { %2223 = vmatprep.subr.msk.bf16.mxu0 %vm3941_vm8, %v2563_v30  ;;  %vm3954_vm8 = vmpackc.low %vm3953_vm9, %vm3953_vm9  ;;  %vm3966_vm9 = vcmask 654336  }
 0x4ab   : > { %2225 = vmatpush3.bf16.msk.msra.mxu0 %vm3942_vm10, %v2563_v30 }
 0x4ac   : > { %2227 = vmatprep.subr.msk.bf16.mxu0 %vm3943_vm4, %v2563_v30  ;;  %vm3956_vm4 = vnez %v3827_v10 }
 0x4af   : > { %2229 = vmatpush3.bf16.msk.msra.mxu0 %vm3944_vm2, %v2563_v30 }
 0x4b0   : > { %2231 = vmatprep.subr.msk.bf16.mxu0 %vm3468_vm13, %v2563_v30  ;;  %vm3949_vm13 = vcmask 1039360  }
 0x4b3   : > { %2233 = vmatpush3.bf16.msk.msra.mxu0 %vm3481_vm3, %v2563_v30  ;;  %vm3950_vm3 = vmmov %vm3949_vm13 }
 0x4b4   : > { %vm3955_vm10 = vmmov %vm3950_vm3 }
 0x4b5   : > { %vm3957_vm2 = vmmov %vm3950_vm3 }
 0x4f9   : > { %v925_v1 = vpop.permute.xlu1 %924 }
 0x4fa   : > { %v936_v38 = vsel %vm3945_vm15, %v3103_v12, %v925_v1  ;;  %v927_v44 = vpop.permute.xlu0 %926  ;;  %v2126_v12 = vpack.c.bf16 %v3121_v22, %v3037_v29  ;;  %vm3958_vm15 = vnez %v3829_v13  ;;  %v1009_v13 = vld [vmem:[#allocation7 + $0x28] sm:$0xff] }
 0x4fb   : > { %v937_v48 = vsel %vm3946_vm0, %v925_v1, %v927_v44  ;;  %vm3959_vm0 = vmmov %vm3957_vm2 }
 0x4fd   : > { %v931_v58 = vpop.permute.xlu1 %930 }
 0x4fe   : > { %v938_v42 = vsel %vm3947_vm5, %v3105_v8, %v931_v58  ;;  %v933_v63 = vpop.permute.xlu0 %932  ;;  %vm3960_vm5 = vmmov %vm3959_vm0 }
 0x4ff   : > { %v939_v50 = vsel %vm3948_vm14, %v931_v58, %v933_v63  ;;  %v2407_v8 = vpack.c.bf16 %v938_v42, %v936_v38  ;;  %vm3961_vm14 = vnez %v3813_v52 }
 0x500   : > { %v2404_v15 = vpack.c.bf16 %v939_v50, %v937_v48 }
 0x501   : > { %v968_v2 = vpop.permute.xlu1 %967 }
 0x502   : > { %v985_v56 = vsel %vm3949_vm13, %v968_v2, %v970_v9  ;;  %v972_v11 = vpop.permute.xlu0 %971  ;;  %2405 = vmatprep.subr.msk.bf16.mxu1 %vm3952_vm11, %v2404_v15  ;;  %vm3962_vm13 = vmpackc.low %vm3961_vm14, %vm3961_vm14  ;;  %vm3965_vm11 = vnez %v3846_v31  ;;  %vm3974_vm14 = vnez %v3894_v18 }
 0x503   : > { %v986_v14 = vsel %vm3950_vm3, %v970_v9, %v972_v11  ;;  %2408 = vmatpush1.bf16.msk.msra.mxu1 %vm3954_vm8, %v2407_v8  ;;  %v2413_v22 = vpack.c.bf16 %v985_v56, %v3127_v32  ;;  %vm3963_vm3 = vnez %v3821_v0  ;;  %vm3967_vm8 = vnez %v3850_v41 }
 0x504   : > { %2127 = vmatprep.subr.bf16.mxu1 %v2126_v12  ;;  %v2410_v21 = vpack.c.bf16 %v986_v14, %v3129_v34  ;;  %vm3964_vm1 = vmpackc.low %vm3963_vm3, %vm3963_vm3  ;;  %vm3976_vm3 = vnez %v3906_v7 }
 0x505   : > { %v978_v16 = vpop.permute.xlu1 %977 }
 0x506   : > { %v976_v17 = vpop.permute.xlu0 %975 }
 0x507   : > { %v988_v37 = vsel %vm3955_vm10, %v976_v17, %v978_v16  ;;  %2129 = vmatpush1.bf16.msra.mxu1 %v2128_v20  ;;  %vm3968_vm10 = vnez %v3857_v45 }
 0x508   : > { %2411 = vmatprep.subr.msk.bf16.mxu1 %vm3956_vm4, %v2410_v21  ;;  %vm3969_vm4 = vnez %v3862_v54 }
 0x509   : > { %v984_v24 = vpop.permute.xlu1 %983 }
 0x50a   : > { %v982_v29 = vpop.permute.xlu0 %981 }
 0x50b   : > { %v990_v35 = vsel %vm3957_vm2, %v982_v29, %v984_v24  ;;  %2414 = vmatpush1.bf16.msk.msra.mxu1 %vm3958_vm15, %v2413_v22  ;;  %vm3970_vm2 = vnez %v3869_v59  ;;  %vm3971_vm15 = vnez %v3876_v61 }
 0x50c   : > { %v2416_v5 = vpack.c.bf16 %v990_v35, %v988_v37 }
 0x50d   : > { %v980_v26 = vpop.permute.xlu1 %979 }
 0x50e   : > { %v989_v27 = vsel %vm3959_vm0, %v980_v26, %v982_v29  ;;  %v974_v19 = vpop.permute.xlu0 %973  ;;  %2417 = vmatprep.subr.msk.bf16.mxu1 %vm3962_vm13, %v2416_v5  ;;  %vm3972_vm0 = vnez %v3882_v53  ;;  %vm3975_vm13 = vnez %v3900_v25 }
 0x50f   : > { %v987_v28 = vsel %vm3960_vm5, %v974_v19, %v976_v17  ;;  %vm3973_vm5 = vnez %v3888_v62 }
 0x510   : > { %v2419_v10 = vpack.c.bf16 %v989_v27, %v987_v28 }
 0x512   : > { %2420 = vmatpush1.bf16.msk.msra.mxu1 %vm3964_vm1, %v2419_v10  ;;  %vm3977_vm1 = vnez %v3912_v40 }
 0x513   : > { %2171 = vmatprep.subr.msk.bf16.mxu1 %vm3965_vm11, %v2563_v30 }
 0x515   : > { %1736 = vmatmul.mubr.msk.f32.vlgmr.msra.gmra.mrb[2].mxu1 %vm3966_vm9, %v1009_v13  ;;  %vm3978_vm9 = vnez %v3918_v51 }
 0x516   : > { %2173 = vmatpush3.bf16.msk.msra.mxu1 %vm3967_vm8, %v2563_v30  ;;  %1474 = vmatprep.mubr.f32.mxu1 %v2763_v6 }
 0x517   : > { %2175 = vmatprep.subr.msk.bf16.mxu1 %vm3968_vm10, %v2563_v30 }
 0x51a   : > { %2177 = vmatpush3.bf16.msk.msra.mxu1 %vm3969_vm4, %v2563_v30 }
 0x51b   : > { %2179 = vmatprep.subr.msk.bf16.mxu1 %vm3970_vm2, %v2563_v30 }
 0x51e   : > { %2181 = vmatpush3.bf16.msk.msra.mxu1 %vm3971_vm15, %v2563_v30 }
 0x51f   : > { %2183 = vmatprep.subr.msk.bf16.mxu1 %vm3972_vm0, %v2563_v30 }
 0x522   : > { %2185 = vmatpush3.bf16.msk.msra.mxu1 %vm3973_vm5, %v2563_v30 }
 0x523   : > { %2187 = vmatprep.subr.msk.bf16.mxu1 %vm3974_vm14, %v2563_v30 }
 0x526   : > { %2189 = vmatpush3.bf16.msk.msra.mxu1 %vm3975_vm13, %v2563_v30 }
 0x527   : > { %2191 = vmatprep.subr.msk.bf16.mxu1 %vm3976_vm3, %v2563_v30 }
 0x52a   : > { %2193 = vmatpush3.bf16.msk.msra.mxu1 %vm3977_vm1, %v2563_v30 }
 0x52b   : > { %2195 = vmatprep.subr.msk.bf16.mxu1 %vm3978_vm9, %v2563_v30 }
 0x52e   : > { %2197 = vmatpush3.bf16.msk.msra.mxu1 %vm3462_vm12, %v2563_v30 }
 0x52f   : > { %2199 = vmatprep.subr.msk.bf16.mxu1 %vm3477_vm7, %v2563_v30 }
 0x532   : > { %2201 = vmatpush3.bf16.msk.msra.mxu1 %vm3488_vm6, %v2563_v30 }
 0x533   : > { %2235 = vmatprep.subr.msk.bf16.mxu1 %vm3965_vm11, %v2563_v30 }
 0x535   : > { %1475 = vmatmul.mubr.f32.vlgmr.msra.gmra.mrb[4].mxu1 %v2753_v4 }
 0x536   : > { %2237 = vmatpush3.bf16.msk.msra.mxu1 %vm3967_vm8, %v2563_v30 }
 0x537   : > { %2239 = vmatprep.subr.msk.bf16.mxu1 %vm3968_vm10, %v2563_v30 }
 0x53a   : > { %2241 = vmatpush3.bf16.msk.msra.mxu1 %vm3969_vm4, %v2563_v30 }
 0x53b   : > { %2243 = vmatprep.subr.msk.bf16.mxu1 %vm3970_vm2, %v2563_v30 }
 0x53e   : > { %2245 = vmatpush3.bf16.msk.msra.mxu1 %vm3971_vm15, %v2563_v30 }
 0x53f   : > { %2247 = vmatprep.subr.msk.bf16.mxu1 %vm3972_vm0, %v2563_v30 }
 0x542   : > { %2249 = vmatpush3.bf16.msk.msra.mxu1 %vm3973_vm5, %v2563_v30 }
 0x543   : > { %2251 = vmatprep.subr.msk.bf16.mxu1 %vm3974_vm14, %v2563_v30 }
 0x546   : > { %2253 = vmatpush3.bf16.msk.msra.mxu1 %vm3975_vm13, %v2563_v30 }
 0x547   : > { %2255 = vmatprep.subr.msk.bf16.mxu1 %vm3976_vm3, %v2563_v30 }
 0x54a   : > { %2257 = vmatpush3.bf16.msk.msra.mxu1 %vm3977_vm1, %v2563_v30 }
 0x54b   : > { %2259 = vmatprep.subr.msk.bf16.mxu1 %vm3978_vm9, %v2563_v30 }
 0x54e   : > { %2261 = vmatpush3.bf16.msk.msra.mxu1 %vm3462_vm12, %v2563_v30 }
 0x54f   : > { %2263 = vmatprep.subr.msk.bf16.mxu1 %vm3477_vm7, %v2563_v30 }
 0x552   : > { %2265 = vmatpush3.bf16.msk.msra.mxu1 %vm3488_vm6, %v2563_v30 }
 0x569   : > { %v1966_v4 = vpop.f32.mrb[8].mxu0 }
 0x56a   : > { %v1967_v6 = vpop.f32.mrb[9].mxu0 }
 0x56b   : > { %v1968_v52 = vadd.f32 %v1967_v6, %v1966_v4 }
 0x5e8   : > { %v1099_v0 = vpop.f32.mrb[2].mxu1 }
 0x5e9   : > { %v1101_v32 = vpop.f32.mrb[3].mxu1  ;;  %v1104_v31 = vmax.f32 %v1099_v0, 0.0 }
 0x5ea   : > { %v1105_v34 = vmax.f32 %v1101_v32, 0.0 }
 0x5ec   : > { %1546 = vmatprep.mubr.f32.mxu0 %v1105_v34  ;;  %1616 = vmatprep.mubr.f32.mxu1 %v1105_v34 }
 0x5ed   : > { %1547 = vmatmul.mubr.f32.vlgmr.msra.gmra.mrb[10].mxu0 %v1104_v31  ;;  %1617 = vmatmul.mubr.f32.vlgmr.msra.gmra.mrb[6].mxu1 %v1104_v31 }
 0x608   : > { %v2001_v41 = vpop.f32.mrb[4].mxu1 }
 0x609   : > { %v2002_v45 = vpop.f32.mrb[5].mxu1 }
 0x60a   : > { %v2003_v54 = vadd.f32 %v2002_v45, %v2001_v41 }
 0x60c   : > { %v1480_v59 = vmax.f32 %v1968_v52, %v2003_v54 }
 0x60e   : > { %1481 = vst [vmem:[%s228_s5] sm:$0xf] %v1480_v59 }
 0x6c0   : > { %v2036_v30 = vpop.f32.mrb[10].mxu0  ;;  %v2071_v61 = vpop.f32.mrb[6].mxu1 }
 0x6c1   : > { %v2037_v53 = vpop.f32.mrb[11].mxu0  ;;  %v2072_v62 = vpop.f32.mrb[7].mxu1 }
 0x6c2   : > { %v2038_v18 = vadd.f32 %v2037_v53, %v2036_v30  ;;  %v2073_v25 = vadd.f32 %v2072_v62, %v2071_v61 }
 0x6c4   : > { %v1622_v7 = vmax.f32 %v2038_v18, %v2073_v25 }
 0x6c6   : > { %1623 = vst [vmem:[%s228_s5 + $0x4] sm:$0xff] %v1622_v7 }
 0x6c7   : > { %2492 = shalt.err (!%p2489_p7)
}
 0x6c8   : > { %s2493_s28 = scalar_lea.hbm %s3689_s12, 256  ;;  %s2497_s14 = scalar_lea.hbm %s3737_s4, 512 }
 0x6c9   : > { %p2494_p9 = scmp.ne.s32.totalorder %s3689_s12, %s2493_s28  ;;  %p2498_p0 = scmp.lt.u32.totalorder %s3689_s12, %s3737_s4 }
 0x6ca   : > { %p2499_p1 = scmp.lt.u32.totalorder %s2497_s14, %s2493_s28  ;;  %p2501_p4 = scmp.lt.u32.totalorder %s2493_s28, %s3689_s12 }
 0x6cb   : > { %p2495_p2 = pnand %p2494_p9, %p2684_p12 }
 0x6cc   : > { %p2500_p11 = por %p2499_p1, %p2498_p0 }
 0x6cd   : > { %p2496_p5 = pneg %p2495_p2 }
 0x6ce   : > { %p2502_p6 = por %p2501_p4, %p2500_p11 }
 0x6d0   : > { %p2503_p8 = pnand %p2502_p6, %p2496_p5 }
 0x6d2   : > { %2506 = shalt.err (!%p2503_p8)
}
 0x6d3   : > { %s2565_s5 = smov 128   ;;  %s2566_s26 = smov 256  }
 0x6d4   : > { %s2567_s8 = smov 8  }
 0x6d5   : > { %2272 = dma.vmem_to_hbm [thread:$0]  (%p2684_p12), %s3684_s7, 256, %s3689_s12, %s1625_s13, %s2565_s5, %s2566_s26, %s2567_s8  }
 0x6d6 PF: > { %s1652_s11 = sand.u32 1, %s2537_s15   ;;  %p3979_p10 = scmp.ne.s32.totalorder %s3788_s22, 0 }
 0x6d7   : > { %p3980_p13 = scmp.ge.s32.totalorder %s2549_s18, 2  ;;  %s1653_s23 = scalar_lea.sflag [#allocation6], %s1652_s11 }
 0x6d9   : > { %p2283_p3 = pnand %p3980_p13, %p3979_p10 }
 0x6db   : > { %2532 = dma.done.wait (!%p2283_p3), %s1653_s23, 256  }
 0x6dc   : > { %2534 = vsyncadd (!%p2283_p3), %s1653_s23, 4294967040  ;;  %p18_p7 = scmp.ge.s32.totalorder %s2649_s27, 4   ;;  %s3981_s15 = smov %s2541_s16 }
 0x6dd   : > { %s3982_s16 = smov %s2545_s17  ;;  %s3983_s17 = smov %s2680_s24 }
 0x6de   : > { %s3984_s18 = smov %s2649_s27  ;;  %20 = sbr.rel (!%p18_p7) target bundleno = 6 (0x6), region = 85 }
 0x6e5   :  { %1658 = vsyncpa [#allocation5], 1 }
 0x6e6   :  { %1660 = vsyncpa [#allocation5 + $0x1], 1 }
 0x6e7   :  { %1661 = vsyncpa [#allocation8], 1 }
 0x6e8   :  { %1662 = vsyncpa [#allocation6], 1 }
 0x6e9   :  { %1664 = vsyncpa [#allocation6 + $0x1], 1 }

</bundles_post_ra>
